<compile_context>
chip_gen: v5e
topology: v5e:2x2
jax: 0.10.0
libtpu: 0.0.40
codegen_flags: <defaults>
</compile_context>

<pallas_src>
import functools

import jax
import jax.numpy as jnp
from jax.experimental import pallas as pl
from jax.experimental.pallas import tpu as pltpu


# ----------------------------------------------------------------------------
# Pallas kernel
# ----------------------------------------------------------------------------
def _lstm_fc_logsoftmax_kernel(
    x_ref,        # (S*B, I)   f32   reinterpreted (S, B, I) view, row t*B+b
    wih0_ref,     # (I, 4H)    f32   layer-0 W_ih^T
    b0_ref,       # (1, 4H)    f32   b_ih0 + b_hh0
    wbig_ref,     # (2H, 8H)   bf16  [[W_hh0^T, W_ih1^T], [0, W_hh1^T]]
    b1_ref,       # (1, 4H)    f32   b_ih1 + b_hh1
    wfc_ref,      # (H, O)     f32   FC weight^T, native column order o = g*C + c
    bfc_ref,      # (1, O)     f32   FC bias, native order
    msum_ref,     # (O, O)     f32   0/1 group-membership matrix (same grid cell)
    out_ref,      # (B, O)     f32   log-probabilities, native order
    *, seq: int, batch: int, hidden: int, grid_sz: int, class_size: int):
    S, B, H = seq, batch, hidden

    def gates(pre, c_prev):
        # pre: (B, 4H) full pre-activation.  One sigmoid over all 4 gates,
        # one tanh for the g quarter, one tanh for the new cell state.
        sig = jax.nn.sigmoid(pre)
        i = sig[:, 0 * H:1 * H]
        f = sig[:, 1 * H:2 * H]
        o = sig[:, 3 * H:4 * H]
        g = jnp.tanh(pre[:, 2 * H:3 * H])
        c_new = f * c_prev + i * g
        h_new = o * jnp.tanh(c_new)
        return h_new, c_new

    # ---- hoisted layer-0 input projection (off the serial chain) -----------
    pre0_all = (jnp.dot(x_ref[...], wih0_ref[...],
                        preferred_element_type=jnp.float32)
                + b0_ref[...])                          # (S*B, 4H)

    # ---- hoist recurrent weight / bias loads out of the unrolled loop ------
    wbig = wbig_ref[...]                                # (2H, 8H) bf16
    b1 = b1_ref[...]                                    # (1, 4H)

    # ---- layer-0, t = 0 (zero initial state => no recurrent term) ----------
    h0, c0 = gates(pre0_all[0:B, :], jnp.zeros((B, H), jnp.float32))
    h1 = jnp.zeros((B, H), jnp.float32)
    c1 = jnp.zeros((B, H), jnp.float32)

    # ---- interleaved recurrence, fully unrolled (S static) -----------------
    for t in range(S):
        # One fused MXU push per step (bf16 single-pass, f32 accumulate).
        lhs = jnp.concatenate([h0, h1], axis=1).astype(jnp.bfloat16)   # (B, 2H)
        r = jnp.dot(lhs, wbig, preferred_element_type=jnp.float32)     # (B, 8H)
        #   r[:, :4H]  = h0_t   @ W_hh0^T           (layer-0 step t+1)
        #   r[:, 4H:]  = h0_t @ W_ih1^T + h1_{t-1} @ W_hh1^T   (layer-1 step t)

        h1, c1 = gates(r[:, 4 * H:8 * H] + b1, c1)      # layer-1 cell t
        if t + 1 < S:                                    # layer-0 cell t+1
            h0, c0 = gates(pre0_all[(t + 1) * B:(t + 2) * B, :]
                           + r[:, 0:4 * H], c0)

    # ---- FC head, native column order ---------------------------------------
    logits = (jnp.dot(h1, wfc_ref[...], preferred_element_type=jnp.float32)
              + bfc_ref[...])                            # (B, O)

    # ---- per-grid-cell log-softmax: 1 exp + 1 log, group sum via 0/1 matmul --
    m_row = jnp.max(logits, axis=-1, keepdims=True)      # (B, 1) row-max stabiliser
    p = jnp.exp(logits - m_row)                          # one EUP exp
    s = jnp.dot(p, msum_ref[...],
                preferred_element_type=jnp.float32)      # (B, O) per-group sums
    out_ref[...] = logits - m_row - jnp.log(s)           # one EUP log, one store


# ----------------------------------------------------------------------------
# One-time parameter preparation (transposes / fusion / bias sums)
# ----------------------------------------------------------------------------
def prepare_params(params, *, hidden_size, grid_size, class_size):
    H, G, C = hidden_size, grid_size, class_size

    wih0T = params["w_ih0"].T                                    # (I, 4H)
    b0 = (params["b_ih0"] + params["b_hh0"]).reshape(1, 4 * H)
    b1 = (params["b_ih1"] + params["b_hh1"]).reshape(1, 4 * H)

    whh0T = params["w_hh0"].T                                    # (H, 4H)
    wih1T = params["w_ih1"].T                                    # (H, 4H)
    whh1T = params["w_hh1"].T                                    # (H, 4H)
    top = jnp.concatenate([whh0T, wih1T], axis=1)                # (H, 8H)
    bot = jnp.concatenate([jnp.zeros((H, 4 * H), jnp.float32), whh1T], axis=1)
    wbig = jnp.concatenate([top, bot], axis=0).astype(jnp.bfloat16)  # (2H, 8H)

    # FC in PyTorch-native order: output unit o = g*C + c.
    wfc = params["w_fc"].T                                       # (H, O)
    bfc = params["b_fc"].reshape(1, G * C)                       # (1, O)

    # 0/1 group-membership matrix: msum[o, o2] = 1 iff same grid cell.
    msum = jnp.kron(jnp.eye(G, dtype=jnp.float32),
                    jnp.ones((C, C), jnp.float32))               # (O, O)

    prepped = dict(wih0T=wih0T, b0=b0, wbig=wbig, b1=b1,
                   wfc=wfc, bfc=bfc, msum=msum)
    return jax.tree_util.tree_map(jnp.asarray, prepped)


# ----------------------------------------------------------------------------
# Forward wrapper (pallas_call)
# ----------------------------------------------------------------------------
@functools.partial(jax.jit, static_argnames=("sequence_size", "hidden_size",
                                             "grid_size", "class_size"))
def lstm_head_forward(x, prepped, *, sequence_size, hidden_size, grid_size,
                      class_size):
    B = x.shape[0]
    S, H, G, C = sequence_size, hidden_size, grid_size, class_size
    # PyTorch: x.contiguous().view(sequence_size, batch, -1) -> flatten rows.
    x_flat = x.astype(jnp.float32).reshape(S * B, -1)            # (S*B, I)

    kernel = functools.partial(_lstm_fc_logsoftmax_kernel,
                               seq=S, batch=B, hidden=H,
                               grid_sz=G, class_size=C)

    out_flat = pl.pallas_call(
        kernel,
        out_shape=jax.ShapeDtypeStruct((B, G * C), jnp.float32),
        in_specs=[pl.BlockSpec(memory_space=pltpu.MemorySpace.VMEM)] * 8,
        out_specs=pl.BlockSpec(memory_space=pltpu.MemorySpace.VMEM),
    )(x_flat, prepped["wih0T"], prepped["b0"], prepped["wbig"],
      prepped["b1"], prepped["wfc"], prepped["bfc"], prepped["msum"])

    # Native column order (o = g*C + c): pure reshape, no transpose op.
    return out_flat.reshape(B, G, C)


# ----------------------------------------------------------------------------
# Pure-JAX reference (mirrors torch.nn.LSTM / Linear / LogSoftmax semantics)
# ----------------------------------------------------------------------------
def reference_forward(x, p, *, sequence_size, hidden_size, grid_size,
                      class_size):
    B = x.shape[0]
    x_sbi = x.astype(jnp.float32).reshape(sequence_size, B, -1)

    def cell(x_t, h, c, w_ih, w_hh, b_ih, b_hh):
        pre = x_t @ w_ih.T + h @ w_hh.T + b_ih + b_hh
        i, f, g, o = jnp.split(pre, 4, axis=-1)
        i = jax.nn.sigmoid(i)
        f = jax.nn.sigmoid(f)
        g = jnp.tanh(g)
        o = jax.nn.sigmoid(o)
        c = f * c + i * g
        h = o * jnp.tanh(c)
        return h, c

    h0 = c0 = h1 = c1 = jnp.zeros((B, hidden_size), jnp.float32)
    for t in range(sequence_size):
        h0, c0 = cell(x_sbi[t], h0, c0, p["w_ih0"], p["w_hh0"],
                      p["b_ih0"], p["b_hh0"])
        h1, c1 = cell(h0, h1, c1, p["w_ih1"], p["w_hh1"],
                      p["b_ih1"], p["b_hh1"])
    logits = h1 @ p["w_fc"].T + p["b_fc"]
    lg = logits.reshape(B, grid_size, class_size)
    return jax.nn.log_softmax(lg, axis=2)


# ----------------------------------------------------------------------------
def make_params(key, input_size, hidden_size, grid_size, class_size):
    H = hidden_size
    O = grid_size * class_size
    k = 1.0 / jnp.sqrt(jnp.float32(H))
    names_shapes = [
        ("w_ih0", (4 * H, input_size)), ("w_hh0", (4 * H, H)),
        ("b_ih0", (4 * H,)), ("b_hh0", (4 * H,)),
        ("w_ih1", (4 * H, H)), ("w_hh1", (4 * H, H)),
        ("b_ih1", (4 * H,)), ("b_hh1", (4 * H,)),
        ("w_fc", (O, H)), ("b_fc", (O,)),
    ]
    params = {}
    for name, shape in names_shapes:
        key, sub = jax.random.split(key)
        params[name] = jax.random.uniform(sub, shape, jnp.float32,
                                          minval=-k, maxval=k)
    return params


if __name__ == "__main__":
    # Small shapes consistent with Model(grid_size, hidden_size, batch_size,
    # sequence_size, class_size).
    batch_size = 2
    sequence_size = 8
    input_size = 16
    hidden_size = 32
    grid_size = 4
    class_size = 3

    key = jax.random.PRNGKey(0)
    key, kx, kp = jax.random.split(key, 3)
    x = jax.random.normal(kx, (batch_size, sequence_size, input_size),
                          jnp.float32)
    params = make_params(kp, input_size, hidden_size, grid_size, class_size)

    # One-time parameter prep (hoisted out of the forward path).
    prepped = prepare_params(params, hidden_size=hidden_size,
                             grid_size=grid_size, class_size=class_size)
    prepped = jax.block_until_ready(prepped)

    out = lstm_head_forward(x, prepped,
                            sequence_size=sequence_size,
                            hidden_size=hidden_size,
                            grid_size=grid_size,
                            class_size=class_size)
    out = jax.block_until_ready(out)

    ref = reference_forward(x, params,
                            sequence_size=sequence_size,
                            hidden_size=hidden_size,
                            grid_size=grid_size,
                            class_size=class_size)
    assert out.shape == (batch_size, grid_size, class_size)
    # Tolerance loosened vs. pure-f32: the serial-chain matmuls now run as
    # single-pass bf16 on the MXU (f32 state / gates / accumulation).
    assert jnp.allclose(out, ref, atol=5e-2, rtol=5e-2), (
        f"max abs err {jnp.max(jnp.abs(out - ref))}")

    print("KERNEL_OK")
</pallas_src>

<mosaic_0001>
module attributes {stable_mosaic.version = 11 : i64} {
  func.func @_lstm_fc_logsoftmax_kernel(%arg0: memref<16x16xf32, #tpu.memory_space<vmem>>, %arg1: memref<16x128xf32, #tpu.memory_space<vmem>>, %arg2: memref<1x128xf32, #tpu.memory_space<vmem>>, %arg3: memref<64x256xbf16, #tpu.memory_space<vmem>>, %arg4: memref<1x128xf32, #tpu.memory_space<vmem>>, %arg5: memref<32x12xf32, #tpu.memory_space<vmem>>, %arg6: memref<1x12xf32, #tpu.memory_space<vmem>>, %arg7: memref<12x12xf32, #tpu.memory_space<vmem>>, %arg8: memref<2x12xf32, #tpu.memory_space<vmem>>) attributes {dimension_semantics = [], scalar_prefetch = 0 : i64, scratch_operands = 0 : i64, tpu.core_type = #tpu.core_type<tc>} {
    %c0 = arith.constant 0 : index
    %c0_0 = arith.constant 0 : index
    %0 = vector.load %arg0[%c0, %c0_0] : memref<16x16xf32, #tpu.memory_space<vmem>>, vector<16x16xf32>
    %c0_1 = arith.constant 0 : index
    %c0_2 = arith.constant 0 : index
    %1 = vector.load %arg1[%c0_1, %c0_2] : memref<16x128xf32, #tpu.memory_space<vmem>>, vector<16x128xf32>
    %cst = arith.constant dense<0.000000e+00> : vector<16x128xf32>
    %2 = tpu.matmul %0, %1, %cst {dimension_numbers = #tpu.dot_dimension_numbers<[1], [0], [0], [1], [0, 0, 1, 1], [], []>} : vector<16x16xf32>, vector<16x128xf32>, vector<16x128xf32> -> vector<16x128xf32>
    %c0_3 = arith.constant 0 : index
    %c0_4 = arith.constant 0 : index
    %3 = vector.load %arg2[%c0_3, %c0_4] : memref<1x128xf32, #tpu.memory_space<vmem>>, vector<1x128xf32>
    %4 = vector.broadcast %3 : vector<1x128xf32> to vector<16x128xf32>
    %5 = arith.addf %2, %4 : vector<16x128xf32>
    %c0_5 = arith.constant 0 : index
    %c0_6 = arith.constant 0 : index
    %6 = vector.load %arg3[%c0_5, %c0_6] : memref<64x256xbf16, #tpu.memory_space<vmem>>, vector<64x256xbf16>
    %c0_7 = arith.constant 0 : index
    %c0_8 = arith.constant 0 : index
    %7 = vector.load %arg4[%c0_7, %c0_8] : memref<1x128xf32, #tpu.memory_space<vmem>>, vector<1x128xf32>
    %8 = vector.extract_strided_slice %5 {offsets = [0, 0], sizes = [2, 128], strides = [1, 1]} : vector<16x128xf32> to vector<2x128xf32>
    %cst_9 = arith.constant 0.000000e+00 : f32
    %9 = vector.broadcast %cst_9 : f32 to vector<2x32xf32>
    %10 = arith.negf %8 : vector<2x128xf32>
    %11 = math.exp %10 : vector<2x128xf32>
    %cst_10 = arith.constant 1.000000e+00 : f32
    %12 = vector.broadcast %cst_10 : f32 to vector<2x128xf32>
    %13 = arith.addf %12, %11 : vector<2x128xf32>
    %14 = arith.divf %12, %13 : vector<2x128xf32>
    %15 = vector.extract_strided_slice %14 {offsets = [0, 0], sizes = [2, 32], strides = [1, 1]} : vector<2x128xf32> to vector<2x32xf32>
    %16 = vector.extract_strided_slice %14 {offsets = [0, 32], sizes = [2, 32], strides = [1, 1]} : vector<2x128xf32> to vector<2x32xf32>
    %17 = vector.extract_strided_slice %14 {offsets = [0, 96], sizes = [2, 32], strides = [1, 1]} : vector<2x128xf32> to vector<2x32xf32>
    %18 = vector.extract_strided_slice %8 {offsets = [0, 64], sizes = [2, 32], strides = [1, 1]} : vector<2x128xf32> to vector<2x32xf32>
    %19 = math.tanh %18 : vector<2x32xf32>
    %20 = arith.mulf %16, %9 : vector<2x32xf32>
    %21 = arith.mulf %15, %19 : vector<2x32xf32>
    %22 = arith.addf %20, %21 : vector<2x32xf32>
    %23 = math.tanh %22 : vector<2x32xf32>
    %24 = arith.mulf %17, %23 : vector<2x32xf32>
    %cst_11 = arith.constant 0.000000e+00 : f32
    %25 = vector.broadcast %cst_11 : f32 to vector<2x32xf32>
    %cst_12 = arith.constant 0.000000e+00 : f32
    %26 = vector.broadcast %cst_12 : f32 to vector<2x32xf32>
    %27 = tpu.concatenate %24, %25 in 1 : vector<2x32xf32>, vector<2x32xf32> -> vector<2x64xf32>
    %28 = arith.truncf %27 : vector<2x64xf32> to vector<2x64xbf16>
    %cst_13 = arith.constant dense<0.000000e+00> : vector<2x256xf32>
    %29 = tpu.matmul %28, %6, %cst_13 {dimension_numbers = #tpu.dot_dimension_numbers<[1], [0], [0], [1], [0, 0, 1, 1], [], []>} : vector<2x64xbf16>, vector<64x256xbf16>, vector<2x256xf32> -> vector<2x256xf32>
    %30 = vector.extract_strided_slice %29 {offsets = [0, 128], sizes = [2, 128], strides = [1, 1]} : vector<2x256xf32> to vector<2x128xf32>
    %31 = vector.broadcast %7 : vector<1x128xf32> to vector<2x128xf32>
    %32 = arith.addf %30, %31 : vector<2x128xf32>
    %33 = arith.negf %32 : vector<2x128xf32>
    %34 = math.exp %33 : vector<2x128xf32>
    %cst_14 = arith.constant 1.000000e+00 : f32
    %35 = vector.broadcast %cst_14 : f32 to vector<2x128xf32>
    %36 = arith.addf %35, %34 : vector<2x128xf32>
    %37 = arith.divf %35, %36 : vector<2x128xf32>
    %38 = vector.extract_strided_slice %37 {offsets = [0, 0], sizes = [2, 32], strides = [1, 1]} : vector<2x128xf32> to vector<2x32xf32>
    %39 = vector.extract_strided_slice %37 {offsets = [0, 32], sizes = [2, 32], strides = [1, 1]} : vector<2x128xf32> to vector<2x32xf32>
    %40 = vector.extract_strided_slice %37 {offsets = [0, 96], sizes = [2, 32], strides = [1, 1]} : vector<2x128xf32> to vector<2x32xf32>
    %41 = vector.extract_strided_slice %32 {offsets = [0, 64], sizes = [2, 32], strides = [1, 1]} : vector<2x128xf32> to vector<2x32xf32>
    %42 = math.tanh %41 : vector<2x32xf32>
    %43 = arith.mulf %39, %26 : vector<2x32xf32>
    %44 = arith.mulf %38, %42 : vector<2x32xf32>
    %45 = arith.addf %43, %44 : vector<2x32xf32>
    %46 = math.tanh %45 : vector<2x32xf32>
    %47 = arith.mulf %40, %46 : vector<2x32xf32>
    %48 = vector.extract_strided_slice %5 {offsets = [2, 0], sizes = [2, 128], strides = [1, 1]} : vector<16x128xf32> to vector<2x128xf32>
    %49 = vector.extract_strided_slice %29 {offsets = [0, 0], sizes = [2, 128], strides = [1, 1]} : vector<2x256xf32> to vector<2x128xf32>
    %50 = arith.addf %48, %49 : vector<2x128xf32>
    %51 = arith.negf %50 : vector<2x128xf32>
    %52 = math.exp %51 : vector<2x128xf32>
    %cst_15 = arith.constant 1.000000e+00 : f32
    %53 = vector.broadcast %cst_15 : f32 to vector<2x128xf32>
    %54 = arith.addf %53, %52 : vector<2x128xf32>
    %55 = arith.divf %53, %54 : vector<2x128xf32>
    %56 = vector.extract_strided_slice %55 {offsets = [0, 0], sizes = [2, 32], strides = [1, 1]} : vector<2x128xf32> to vector<2x32xf32>
    %57 = vector.extract_strided_slice %55 {offsets = [0, 32], sizes = [2, 32], strides = [1, 1]} : vector<2x128xf32> to vector<2x32xf32>
    %58 = vector.extract_strided_slice %55 {offsets = [0, 96], sizes = [2, 32], strides = [1, 1]} : vector<2x128xf32> to vector<2x32xf32>
    %59 = vector.extract_strided_slice %50 {offsets = [0, 64], sizes = [2, 32], strides = [1, 1]} : vector<2x128xf32> to vector<2x32xf32>
    %60 = math.tanh %59 : vector<2x32xf32>
    %61 = arith.mulf %57, %22 : vector<2x32xf32>
    %62 = arith.mulf %56, %60 : vector<2x32xf32>
    %63 = arith.addf %61, %62 : vector<2x32xf32>
    %64 = math.tanh %63 : vector<2x32xf32>
    %65 = arith.mulf %58, %64 : vector<2x32xf32>
    %66 = tpu.concatenate %65, %47 in 1 : vector<2x32xf32>, vector<2x32xf32> -> vector<2x64xf32>
    %67 = arith.truncf %66 : vector<2x64xf32> to vector<2x64xbf16>
    %cst_16 = arith.constant dense<0.000000e+00> : vector<2x256xf32>
    %68 = tpu.matmul %67, %6, %cst_16 {dimension_numbers = #tpu.dot_dimension_numbers<[1], [0], [0], [1], [0, 0, 1, 1], [], []>} : vector<2x64xbf16>, vector<64x256xbf16>, vector<2x256xf32> -> vector<2x256xf32>
    %69 = vector.extract_strided_slice %68 {offsets = [0, 128], sizes = [2, 128], strides = [1, 1]} : vector<2x256xf32> to vector<2x128xf32>
    %70 = vector.broadcast %7 : vector<1x128xf32> to vector<2x128xf32>
    %71 = arith.addf %69, %70 : vector<2x128xf32>
    %72 = arith.negf %71 : vector<2x128xf32>
    %73 = math.exp %72 : vector<2x128xf32>
    %cst_17 = arith.constant 1.000000e+00 : f32
    %74 = vector.broadcast %cst_17 : f32 to vector<2x128xf32>
    %75 = arith.addf %74, %73 : vector<2x128xf32>
    %76 = arith.divf %74, %75 : vector<2x128xf32>
    %77 = vector.extract_strided_slice %76 {offsets = [0, 0], sizes = [2, 32], strides = [1, 1]} : vector<2x128xf32> to vector<2x32xf32>
    %78 = vector.extract_strided_slice %76 {offsets = [0, 32], sizes = [2, 32], strides = [1, 1]} : vector<2x128xf32> to vector<2x32xf32>
    %79 = vector.extract_strided_slice %76 {offsets = [0, 96], sizes = [2, 32], strides = [1, 1]} : vector<2x128xf32> to vector<2x32xf32>
    %80 = vector.extract_strided_slice %71 {offsets = [0, 64], sizes = [2, 32], strides = [1, 1]} : vector<2x128xf32> to vector<2x32xf32>
    %81 = math.tanh %80 : vector<2x32xf32>
    %82 = arith.mulf %78, %45 : vector<2x32xf32>
    %83 = arith.mulf %77, %81 : vector<2x32xf32>
    %84 = arith.addf %82, %83 : vector<2x32xf32>
    %85 = math.tanh %84 : vector<2x32xf32>
    %86 = arith.mulf %79, %85 : vector<2x32xf32>
    %87 = vector.extract_strided_slice %5 {offsets = [4, 0], sizes = [2, 128], strides = [1, 1]} : vector<16x128xf32> to vector<2x128xf32>
    %88 = vector.extract_strided_slice %68 {offsets = [0, 0], sizes = [2, 128], strides = [1, 1]} : vector<2x256xf32> to vector<2x128xf32>
    %89 = arith.addf %87, %88 : vector<2x128xf32>
    %90 = arith.negf %89 : vector<2x128xf32>
    %91 = math.exp %90 : vector<2x128xf32>
    %cst_18 = arith.constant 1.000000e+00 : f32
    %92 = vector.broadcast %cst_18 : f32 to vector<2x128xf32>
    %93 = arith.addf %92, %91 : vector<2x128xf32>
    %94 = arith.divf %92, %93 : vector<2x128xf32>
    %95 = vector.extract_strided_slice %94 {offsets = [0, 0], sizes = [2, 32], strides = [1, 1]} : vector<2x128xf32> to vector<2x32xf32>
    %96 = vector.extract_strided_slice %94 {offsets = [0, 32], sizes = [2, 32], strides = [1, 1]} : vector<2x128xf32> to vector<2x32xf32>
    %97 = vector.extract_strided_slice %94 {offsets = [0, 96], sizes = [2, 32], strides = [1, 1]} : vector<2x128xf32> to vector<2x32xf32>
    %98 = vector.extract_strided_slice %89 {offsets = [0, 64], sizes = [2, 32], strides = [1, 1]} : vector<2x128xf32> to vector<2x32xf32>
    %99 = math.tanh %98 : vector<2x32xf32>
    %100 = arith.mulf %96, %63 : vector<2x32xf32>
    %101 = arith.mulf %95, %99 : vector<2x32xf32>
    %102 = arith.addf %100, %101 : vector<2x32xf32>
    %103 = math.tanh %102 : vector<2x32xf32>
    %104 = arith.mulf %97, %103 : vector<2x32xf32>
    %105 = tpu.concatenate %104, %86 in 1 : vector<2x32xf32>, vector<2x32xf32> -> vector<2x64xf32>
    %106 = arith.truncf %105 : vector<2x64xf32> to vector<2x64xbf16>
    %cst_19 = arith.constant dense<0.000000e+00> : vector<2x256xf32>
    %107 = tpu.matmul %106, %6, %cst_19 {dimension_numbers = #tpu.dot_dimension_numbers<[1], [0], [0], [1], [0, 0, 1, 1], [], []>} : vector<2x64xbf16>, vector<64x256xbf16>, vector<2x256xf32> -> vector<2x256xf32>
    %108 = vector.extract_strided_slice %107 {offsets = [0, 128], sizes = [2, 128], strides = [1, 1]} : vector<2x256xf32> to vector<2x128xf32>
    %109 = vector.broadcast %7 : vector<1x128xf32> to vector<2x128xf32>
    %110 = arith.addf %108, %109 : vector<2x128xf32>
    %111 = arith.negf %110 : vector<2x128xf32>
    %112 = math.exp %111 : vector<2x128xf32>
    %cst_20 = arith.constant 1.000000e+00 : f32
    %113 = vector.broadcast %cst_20 : f32 to vector<2x128xf32>
    %114 = arith.addf %113, %112 : vector<2x128xf32>
    %115 = arith.divf %113, %114 : vector<2x128xf32>
    %116 = vector.extract_strided_slice %115 {offsets = [0, 0], sizes = [2, 32], strides = [1, 1]} : vector<2x128xf32> to vector<2x32xf32>
    %117 = vector.extract_strided_slice %115 {offsets = [0, 32], sizes = [2, 32], strides = [1, 1]} : vector<2x128xf32> to vector<2x32xf32>
    %118 = vector.extract_strided_slice %115 {offsets = [0, 96], sizes = [2, 32], strides = [1, 1]} : vector<2x128xf32> to vector<2x32xf32>
    %119 = vector.extract_strided_slice %110 {offsets = [0, 64], sizes = [2, 32], strides = [1, 1]} : vector<2x128xf32> to vector<2x32xf32>
    %120 = math.tanh %119 : vector<2x32xf32>
    %121 = arith.mulf %117, %84 : vector<2x32xf32>
    %122 = arith.mulf %116, %120 : vector<2x32xf32>
    %123 = arith.addf %121, %122 : vector<2x32xf32>
    %124 = math.tanh %123 : vector<2x32xf32>
    %125 = arith.mulf %118, %124 : vector<2x32xf32>
    %126 = vector.extract_strided_slice %5 {offsets = [6, 0], sizes = [2, 128], strides = [1, 1]} : vector<16x128xf32> to vector<2x128xf32>
    %127 = vector.extract_strided_slice %107 {offsets = [0, 0], sizes = [2, 128], strides = [1, 1]} : vector<2x256xf32> to vector<2x128xf32>
    %128 = arith.addf %126, %127 : vector<2x128xf32>
    %129 = arith.negf %128 : vector<2x128xf32>
    %130 = math.exp %129 : vector<2x128xf32>
    %cst_21 = arith.constant 1.000000e+00 : f32
    %131 = vector.broadcast %cst_21 : f32 to vector<2x128xf32>
    %132 = arith.addf %131, %130 : vector<2x128xf32>
    %133 = arith.divf %131, %132 : vector<2x128xf32>
    %134 = vector.extract_strided_slice %133 {offsets = [0, 0], sizes = [2, 32], strides = [1, 1]} : vector<2x128xf32> to vector<2x32xf32>
    %135 = vector.extract_strided_slice %133 {offsets = [0, 32], sizes = [2, 32], strides = [1, 1]} : vector<2x128xf32> to vector<2x32xf32>
    %136 = vector.extract_strided_slice %133 {offsets = [0, 96], sizes = [2, 32], strides = [1, 1]} : vector<2x128xf32> to vector<2x32xf32>
    %137 = vector.extract_strided_slice %128 {offsets = [0, 64], sizes = [2, 32], strides = [1, 1]} : vector<2x128xf32> to vector<2x32xf32>
    %138 = math.tanh %137 : vector<2x32xf32>
    %139 = arith.mulf %135, %102 : vector<2x32xf32>
    %140 = arith.mulf %134, %138 : vector<2x32xf32>
    %141 = arith.addf %139, %140 : vector<2x32xf32>
    %142 = math.tanh %141 : vector<2x32xf32>
    %143 = arith.mulf %136, %142 : vector<2x32xf32>
    %144 = tpu.concatenate %143, %125 in 1 : vector<2x32xf32>, vector<2x32xf32> -> vector<2x64xf32>
    %145 = arith.truncf %144 : vector<2x64xf32> to vector<2x64xbf16>
    %cst_22 = arith.constant dense<0.000000e+00> : vector<2x256xf32>
    %146 = tpu.matmul %145, %6, %cst_22 {dimension_numbers = #tpu.dot_dimension_numbers<[1], [0], [0], [1], [0, 0, 1, 1], [], []>} : vector<2x64xbf16>, vector<64x256xbf16>, vector<2x256xf32> -> vector<2x256xf32>
    %147 = vector.extract_strided_slice %146 {offsets = [0, 128], sizes = [2, 128], strides = [1, 1]} : vector<2x256xf32> to vector<2x128xf32>
    %148 = vector.broadcast %7 : vector<1x128xf32> to vector<2x128xf32>
    %149 = arith.addf %147, %148 : vector<2x128xf32>
    %150 = arith.negf %149 : vector<2x128xf32>
    %151 = math.exp %150 : vector<2x128xf32>
    %cst_23 = arith.constant 1.000000e+00 : f32
    %152 = vector.broadcast %cst_23 : f32 to vector<2x128xf32>
    %153 = arith.addf %152, %151 : vector<2x128xf32>
    %154 = arith.divf %152, %153 : vector<2x128xf32>
    %155 = vector.extract_strided_slice %154 {offsets = [0, 0], sizes = [2, 32], strides = [1, 1]} : vector<2x128xf32> to vector<2x32xf32>
    %156 = vector.extract_strided_slice %154 {offsets = [0, 32], sizes = [2, 32], strides = [1, 1]} : vector<2x128xf32> to vector<2x32xf32>
    %157 = vector.extract_strided_slice %154 {offsets = [0, 96], sizes = [2, 32], strides = [1, 1]} : vector<2x128xf32> to vector<2x32xf32>
    %158 = vector.extract_strided_slice %149 {offsets = [0, 64], sizes = [2, 32], strides = [1, 1]} : vector<2x128xf32> to vector<2x32xf32>
    %159 = math.tanh %158 : vector<2x32xf32>
    %160 = arith.mulf %156, %123 : vector<2x32xf32>
    %161 = arith.mulf %155, %159 : vector<2x32xf32>
    %162 = arith.addf %160, %161 : vector<2x32xf32>
    %163 = math.tanh %162 : vector<2x32xf32>
    %164 = arith.mulf %157, %163 : vector<2x32xf32>
    %165 = vector.extract_strided_slice %5 {offsets = [8, 0], sizes = [2, 128], strides = [1, 1]} : vector<16x128xf32> to vector<2x128xf32>
    %166 = vector.extract_strided_slice %146 {offsets = [0, 0], sizes = [2, 128], strides = [1, 1]} : vector<2x256xf32> to vector<2x128xf32>
    %167 = arith.addf %165, %166 : vector<2x128xf32>
    %168 = arith.negf %167 : vector<2x128xf32>
    %169 = math.exp %168 : vector<2x128xf32>
    %cst_24 = arith.constant 1.000000e+00 : f32
    %170 = vector.broadcast %cst_24 : f32 to vector<2x128xf32>
    %171 = arith.addf %170, %169 : vector<2x128xf32>
    %172 = arith.divf %170, %171 : vector<2x128xf32>
    %173 = vector.extract_strided_slice %172 {offsets = [0, 0], sizes = [2, 32], strides = [1, 1]} : vector<2x128xf32> to vector<2x32xf32>
    %174 = vector.extract_strided_slice %172 {offsets = [0, 32], sizes = [2, 32], strides = [1, 1]} : vector<2x128xf32> to vector<2x32xf32>
    %175 = vector.extract_strided_slice %172 {offsets = [0, 96], sizes = [2, 32], strides = [1, 1]} : vector<2x128xf32> to vector<2x32xf32>
    %176 = vector.extract_strided_slice %167 {offsets = [0, 64], sizes = [2, 32], strides = [1, 1]} : vector<2x128xf32> to vector<2x32xf32>
    %177 = math.tanh %176 : vector<2x32xf32>
    %178 = arith.mulf %174, %141 : vector<2x32xf32>
    %179 = arith.mulf %173, %177 : vector<2x32xf32>
    %180 = arith.addf %178, %179 : vector<2x32xf32>
    %181 = math.tanh %180 : vector<2x32xf32>
    %182 = arith.mulf %175, %181 : vector<2x32xf32>
    %183 = tpu.concatenate %182, %164 in 1 : vector<2x32xf32>, vector<2x32xf32> -> vector<2x64xf32>
    %184 = arith.truncf %183 : vector<2x64xf32> to vector<2x64xbf16>
    %cst_25 = arith.constant dense<0.000000e+00> : vector<2x256xf32>
    %185 = tpu.matmul %184, %6, %cst_25 {dimension_numbers = #tpu.dot_dimension_numbers<[1], [0], [0], [1], [0, 0, 1, 1], [], []>} : vector<2x64xbf16>, vector<64x256xbf16>, vector<2x256xf32> -> vector<2x256xf32>
    %186 = vector.extract_strided_slice %185 {offsets = [0, 128], sizes = [2, 128], strides = [1, 1]} : vector<2x256xf32> to vector<2x128xf32>
    %187 = vector.broadcast %7 : vector<1x128xf32> to vector<2x128xf32>
    %188 = arith.addf %186, %187 : vector<2x128xf32>
    %189 = arith.negf %188 : vector<2x128xf32>
    %190 = math.exp %189 : vector<2x128xf32>
    %cst_26 = arith.constant 1.000000e+00 : f32
    %191 = vector.broadcast %cst_26 : f32 to vector<2x128xf32>
    %192 = arith.addf %191, %190 : vector<2x128xf32>
    %193 = arith.divf %191, %192 : vector<2x128xf32>
    %194 = vector.extract_strided_slice %193 {offsets = [0, 0], sizes = [2, 32], strides = [1, 1]} : vector<2x128xf32> to vector<2x32xf32>
    %195 = vector.extract_strided_slice %193 {offsets = [0, 32], sizes = [2, 32], strides = [1, 1]} : vector<2x128xf32> to vector<2x32xf32>
    %196 = vector.extract_strided_slice %193 {offsets = [0, 96], sizes = [2, 32], strides = [1, 1]} : vector<2x128xf32> to vector<2x32xf32>
    %197 = vector.extract_strided_slice %188 {offsets = [0, 64], sizes = [2, 32], strides = [1, 1]} : vector<2x128xf32> to vector<2x32xf32>
    %198 = math.tanh %197 : vector<2x32xf32>
    %199 = arith.mulf %195, %162 : vector<2x32xf32>
    %200 = arith.mulf %194, %198 : vector<2x32xf32>
    %201 = arith.addf %199, %200 : vector<2x32xf32>
    %202 = math.tanh %201 : vector<2x32xf32>
    %203 = arith.mulf %196, %202 : vector<2x32xf32>
    %204 = vector.extract_strided_slice %5 {offsets = [10, 0], sizes = [2, 128], strides = [1, 1]} : vector<16x128xf32> to vector<2x128xf32>
    %205 = vector.extract_strided_slice %185 {offsets = [0, 0], sizes = [2, 128], strides = [1, 1]} : vector<2x256xf32> to vector<2x128xf32>
    %206 = arith.addf %204, %205 : vector<2x128xf32>
    %207 = arith.negf %206 : vector<2x128xf32>
    %208 = math.exp %207 : vector<2x128xf32>
    %cst_27 = arith.constant 1.000000e+00 : f32
    %209 = vector.broadcast %cst_27 : f32 to vector<2x128xf32>
    %210 = arith.addf %209, %208 : vector<2x128xf32>
    %211 = arith.divf %209, %210 : vector<2x128xf32>
    %212 = vector.extract_strided_slice %211 {offsets = [0, 0], sizes = [2, 32], strides = [1, 1]} : vector<2x128xf32> to vector<2x32xf32>
    %213 = vector.extract_strided_slice %211 {offsets = [0, 32], sizes = [2, 32], strides = [1, 1]} : vector<2x128xf32> to vector<2x32xf32>
    %214 = vector.extract_strided_slice %211 {offsets = [0, 96], sizes = [2, 32], strides = [1, 1]} : vector<2x128xf32> to vector<2x32xf32>
    %215 = vector.extract_strided_slice %206 {offsets = [0, 64], sizes = [2, 32], strides = [1, 1]} : vector<2x128xf32> to vector<2x32xf32>
    %216 = math.tanh %215 : vector<2x32xf32>
    %217 = arith.mulf %213, %180 : vector<2x32xf32>
    %218 = arith.mulf %212, %216 : vector<2x32xf32>
    %219 = arith.addf %217, %218 : vector<2x32xf32>
    %220 = math.tanh %219 : vector<2x32xf32>
    %221 = arith.mulf %214, %220 : vector<2x32xf32>
    %222 = tpu.concatenate %221, %203 in 1 : vector<2x32xf32>, vector<2x32xf32> -> vector<2x64xf32>
    %223 = arith.truncf %222 : vector<2x64xf32> to vector<2x64xbf16>
    %cst_28 = arith.constant dense<0.000000e+00> : vector<2x256xf32>
    %224 = tpu.matmul %223, %6, %cst_28 {dimension_numbers = #tpu.dot_dimension_numbers<[1], [0], [0], [1], [0, 0, 1, 1], [], []>} : vector<2x64xbf16>, vector<64x256xbf16>, vector<2x256xf32> -> vector<2x256xf32>
    %225 = vector.extract_strided_slice %224 {offsets = [0, 128], sizes = [2, 128], strides = [1, 1]} : vector<2x256xf32> to vector<2x128xf32>
    %226 = vector.broadcast %7 : vector<1x128xf32> to vector<2x128xf32>
    %227 = arith.addf %225, %226 : vector<2x128xf32>
    %228 = arith.negf %227 : vector<2x128xf32>
    %229 = math.exp %228 : vector<2x128xf32>
    %cst_29 = arith.constant 1.000000e+00 : f32
    %230 = vector.broadcast %cst_29 : f32 to vector<2x128xf32>
    %231 = arith.addf %230, %229 : vector<2x128xf32>
    %232 = arith.divf %230, %231 : vector<2x128xf32>
    %233 = vector.extract_strided_slice %232 {offsets = [0, 0], sizes = [2, 32], strides = [1, 1]} : vector<2x128xf32> to vector<2x32xf32>
    %234 = vector.extract_strided_slice %232 {offsets = [0, 32], sizes = [2, 32], strides = [1, 1]} : vector<2x128xf32> to vector<2x32xf32>
    %235 = vector.extract_strided_slice %232 {offsets = [0, 96], sizes = [2, 32], strides = [1, 1]} : vector<2x128xf32> to vector<2x32xf32>
    %236 = vector.extract_strided_slice %227 {offsets = [0, 64], sizes = [2, 32], strides = [1, 1]} : vector<2x128xf32> to vector<2x32xf32>
    %237 = math.tanh %236 : vector<2x32xf32>
    %238 = arith.mulf %234, %201 : vector<2x32xf32>
    %239 = arith.mulf %233, %237 : vector<2x32xf32>
    %240 = arith.addf %238, %239 : vector<2x32xf32>
    %241 = math.tanh %240 : vector<2x32xf32>
    %242 = arith.mulf %235, %241 : vector<2x32xf32>
    %243 = vector.extract_strided_slice %5 {offsets = [12, 0], sizes = [2, 128], strides = [1, 1]} : vector<16x128xf32> to vector<2x128xf32>
    %244 = vector.extract_strided_slice %224 {offsets = [0, 0], sizes = [2, 128], strides = [1, 1]} : vector<2x256xf32> to vector<2x128xf32>
    %245 = arith.addf %243, %244 : vector<2x128xf32>
    %246 = arith.negf %245 : vector<2x128xf32>
    %247 = math.exp %246 : vector<2x128xf32>
    %cst_30 = arith.constant 1.000000e+00 : f32
    %248 = vector.broadcast %cst_30 : f32 to vector<2x128xf32>
    %249 = arith.addf %248, %247 : vector<2x128xf32>
    %250 = arith.divf %248, %249 : vector<2x128xf32>
    %251 = vector.extract_strided_slice %250 {offsets = [0, 0], sizes = [2, 32], strides = [1, 1]} : vector<2x128xf32> to vector<2x32xf32>
    %252 = vector.extract_strided_slice %250 {offsets = [0, 32], sizes = [2, 32], strides = [1, 1]} : vector<2x128xf32> to vector<2x32xf32>
    %253 = vector.extract_strided_slice %250 {offsets = [0, 96], sizes = [2, 32], strides = [1, 1]} : vector<2x128xf32> to vector<2x32xf32>
    %254 = vector.extract_strided_slice %245 {offsets = [0, 64], sizes = [2, 32], strides = [1, 1]} : vector<2x128xf32> to vector<2x32xf32>
    %255 = math.tanh %254 : vector<2x32xf32>
    %256 = arith.mulf %252, %219 : vector<2x32xf32>
    %257 = arith.mulf %251, %255 : vector<2x32xf32>
    %258 = arith.addf %256, %257 : vector<2x32xf32>
    %259 = math.tanh %258 : vector<2x32xf32>
    %260 = arith.mulf %253, %259 : vector<2x32xf32>
    %261 = tpu.concatenate %260, %242 in 1 : vector<2x32xf32>, vector<2x32xf32> -> vector<2x64xf32>
    %262 = arith.truncf %261 : vector<2x64xf32> to vector<2x64xbf16>
    %cst_31 = arith.constant dense<0.000000e+00> : vector<2x256xf32>
    %263 = tpu.matmul %262, %6, %cst_31 {dimension_numbers = #tpu.dot_dimension_numbers<[1], [0], [0], [1], [0, 0, 1, 1], [], []>} : vector<2x64xbf16>, vector<64x256xbf16>, vector<2x256xf32> -> vector<2x256xf32>
    %264 = vector.extract_strided_slice %263 {offsets = [0, 128], sizes = [2, 128], strides = [1, 1]} : vector<2x256xf32> to vector<2x128xf32>
    %265 = vector.broadcast %7 : vector<1x128xf32> to vector<2x128xf32>
    %266 = arith.addf %264, %265 : vector<2x128xf32>
    %267 = arith.negf %266 : vector<2x128xf32>
    %268 = math.exp %267 : vector<2x128xf32>
    %cst_32 = arith.constant 1.000000e+00 : f32
    %269 = vector.broadcast %cst_32 : f32 to vector<2x128xf32>
    %270 = arith.addf %269, %268 : vector<2x128xf32>
    %271 = arith.divf %269, %270 : vector<2x128xf32>
    %272 = vector.extract_strided_slice %271 {offsets = [0, 0], sizes = [2, 32], strides = [1, 1]} : vector<2x128xf32> to vector<2x32xf32>
    %273 = vector.extract_strided_slice %271 {offsets = [0, 32], sizes = [2, 32], strides = [1, 1]} : vector<2x128xf32> to vector<2x32xf32>
    %274 = vector.extract_strided_slice %271 {offsets = [0, 96], sizes = [2, 32], strides = [1, 1]} : vector<2x128xf32> to vector<2x32xf32>
    %275 = vector.extract_strided_slice %266 {offsets = [0, 64], sizes = [2, 32], strides = [1, 1]} : vector<2x128xf32> to vector<2x32xf32>
    %276 = math.tanh %275 : vector<2x32xf32>
    %277 = arith.mulf %273, %240 : vector<2x32xf32>
    %278 = arith.mulf %272, %276 : vector<2x32xf32>
    %279 = arith.addf %277, %278 : vector<2x32xf32>
    %280 = math.tanh %279 : vector<2x32xf32>
    %281 = arith.mulf %274, %280 : vector<2x32xf32>
    %282 = vector.extract_strided_slice %5 {offsets = [14, 0], sizes = [2, 128], strides = [1, 1]} : vector<16x128xf32> to vector<2x128xf32>
    %283 = vector.extract_strided_slice %263 {offsets = [0, 0], sizes = [2, 128], strides = [1, 1]} : vector<2x256xf32> to vector<2x128xf32>
    %284 = arith.addf %282, %283 : vector<2x128xf32>
    %285 = arith.negf %284 : vector<2x128xf32>
    %286 = math.exp %285 : vector<2x128xf32>
    %cst_33 = arith.constant 1.000000e+00 : f32
    %287 = vector.broadcast %cst_33 : f32 to vector<2x128xf32>
    %288 = arith.addf %287, %286 : vector<2x128xf32>
    %289 = arith.divf %287, %288 : vector<2x128xf32>
    %290 = vector.extract_strided_slice %289 {offsets = [0, 0], sizes = [2, 32], strides = [1, 1]} : vector<2x128xf32> to vector<2x32xf32>
    %291 = vector.extract_strided_slice %289 {offsets = [0, 32], sizes = [2, 32], strides = [1, 1]} : vector<2x128xf32> to vector<2x32xf32>
    %292 = vector.extract_strided_slice %289 {offsets = [0, 96], sizes = [2, 32], strides = [1, 1]} : vector<2x128xf32> to vector<2x32xf32>
    %293 = vector.extract_strided_slice %284 {offsets = [0, 64], sizes = [2, 32], strides = [1, 1]} : vector<2x128xf32> to vector<2x32xf32>
    %294 = math.tanh %293 : vector<2x32xf32>
    %295 = arith.mulf %291, %258 : vector<2x32xf32>
    %296 = arith.mulf %290, %294 : vector<2x32xf32>
    %297 = arith.addf %295, %296 : vector<2x32xf32>
    %298 = math.tanh %297 : vector<2x32xf32>
    %299 = arith.mulf %292, %298 : vector<2x32xf32>
    %300 = tpu.concatenate %299, %281 in 1 : vector<2x32xf32>, vector<2x32xf32> -> vector<2x64xf32>
    %301 = arith.truncf %300 : vector<2x64xf32> to vector<2x64xbf16>
    %cst_34 = arith.constant dense<0.000000e+00> : vector<2x256xf32>
    %302 = tpu.matmul %301, %6, %cst_34 {dimension_numbers = #tpu.dot_dimension_numbers<[1], [0], [0], [1], [0, 0, 1, 1], [], []>} : vector<2x64xbf16>, vector<64x256xbf16>, vector<2x256xf32> -> vector<2x256xf32>
    %303 = vector.extract_strided_slice %302 {offsets = [0, 128], sizes = [2, 128], strides = [1, 1]} : vector<2x256xf32> to vector<2x128xf32>
    %304 = vector.broadcast %7 : vector<1x128xf32> to vector<2x128xf32>
    %305 = arith.addf %303, %304 : vector<2x128xf32>
    %306 = arith.negf %305 : vector<2x128xf32>
    %307 = math.exp %306 : vector<2x128xf32>
    %cst_35 = arith.constant 1.000000e+00 : f32
    %308 = vector.broadcast %cst_35 : f32 to vector<2x128xf32>
    %309 = arith.addf %308, %307 : vector<2x128xf32>
    %310 = arith.divf %308, %309 : vector<2x128xf32>
    %311 = vector.extract_strided_slice %310 {offsets = [0, 0], sizes = [2, 32], strides = [1, 1]} : vector<2x128xf32> to vector<2x32xf32>
    %312 = vector.extract_strided_slice %310 {offsets = [0, 32], sizes = [2, 32], strides = [1, 1]} : vector<2x128xf32> to vector<2x32xf32>
    %313 = vector.extract_strided_slice %310 {offsets = [0, 96], sizes = [2, 32], strides = [1, 1]} : vector<2x128xf32> to vector<2x32xf32>
    %314 = vector.extract_strided_slice %305 {offsets = [0, 64], sizes = [2, 32], strides = [1, 1]} : vector<2x128xf32> to vector<2x32xf32>
    %315 = math.tanh %314 : vector<2x32xf32>
    %316 = arith.mulf %312, %279 : vector<2x32xf32>
    %317 = arith.mulf %311, %315 : vector<2x32xf32>
    %318 = arith.addf %316, %317 : vector<2x32xf32>
    %319 = math.tanh %318 : vector<2x32xf32>
    %320 = arith.mulf %313, %319 : vector<2x32xf32>
    %c0_36 = arith.constant 0 : index
    %c0_37 = arith.constant 0 : index
    %321 = vector.load %arg5[%c0_36, %c0_37] : memref<32x12xf32, #tpu.memory_space<vmem>>, vector<32x12xf32>
    %cst_38 = arith.constant dense<0.000000e+00> : vector<2x12xf32>
    %322 = tpu.matmul %320, %321, %cst_38 {dimension_numbers = #tpu.dot_dimension_numbers<[1], [0], [0], [1], [0, 0, 1, 1], [], []>} : vector<2x32xf32>, vector<32x12xf32>, vector<2x12xf32> -> vector<2x12xf32>
    %c0_39 = arith.constant 0 : index
    %c0_40 = arith.constant 0 : index
    %323 = vector.load %arg6[%c0_39, %c0_40] : memref<1x12xf32, #tpu.memory_space<vmem>>, vector<1x12xf32>
    %324 = vector.broadcast %323 : vector<1x12xf32> to vector<2x12xf32>
    %325 = arith.addf %322, %324 : vector<2x12xf32>
    %cst_41 = arith.constant dense<0xFF800000> : vector<2xf32>
    %326 = vector.multi_reduction <maximumf>, %325, %cst_41 [1] : vector<2x12xf32> to vector<2xf32>
    %327 = vector.shape_cast %326 : vector<2xf32> to vector<2x1xf32>
    %328 = vector.broadcast %327 : vector<2x1xf32> to vector<2x12xf32>
    %329 = arith.subf %325, %328 : vector<2x12xf32>
    %330 = math.exp %329 : vector<2x12xf32>
    %c0_42 = arith.constant 0 : index
    %c0_43 = arith.constant 0 : index
    %331 = vector.load %arg7[%c0_42, %c0_43] : memref<12x12xf32, #tpu.memory_space<vmem>>, vector<12x12xf32>
    %cst_44 = arith.constant dense<0.000000e+00> : vector<2x12xf32>
    %332 = tpu.matmul %330, %331, %cst_44 {dimension_numbers = #tpu.dot_dimension_numbers<[1], [0], [0], [1], [0, 0, 1, 1], [], []>} : vector<2x12xf32>, vector<12x12xf32>, vector<2x12xf32> -> vector<2x12xf32>
    %333 = vector.broadcast %327 : vector<2x1xf32> to vector<2x12xf32>
    %334 = arith.subf %325, %333 : vector<2x12xf32>
    %335 = math.log %332 : vector<2x12xf32>
    %336 = arith.subf %334, %335 : vector<2x12xf32>
    %c0_45 = arith.constant 0 : index
    %c0_46 = arith.constant 0 : index
    %337 = vector.load %arg8[%c0_45, %c0_46] : memref<2x12xf32, #tpu.memory_space<vmem>>, vector<2x12xf32>
    tpu.vector_store %arg8[%c0_45, %c0_46], %336 {strides = array<i32>} : memref<2x12xf32, #tpu.memory_space<vmem>>, vector<2x12xf32>,
    return
  }
}

</mosaic_0001>

<bundles_post_ra>
// kernel: lstm_head_forward.1
= control target key start
LH: loop header
LB: loop body
LE: loop exit
PB: predicated region body
PF: predicated region fallthrough
CT: control target
= control target key end

     0   :  { %13 = vsyncpa [#allocation3], 0  ;;  %s1419_s30 = smov [#allocation2]   ;;  %s1420_s10 = smov 128   ;;  %s1769_s0 = inlined_call_operand.vmem [shape: f32[16,16], index: 0, kind: input, shape index: {}]   ;;  %s1770_s1 = inlined_call_operand.vmem [shape: f32[16,128], index: 1, kind: input, shape index: {}]   ;;  %s1771_s2 = inlined_call_operand.vmem [shape: f32[1,128], index: 2, kind: input, shape index: {}]   ;;  %s1772_s3 = inlined_call_operand.hbm [shape: bf16[64,256], index: 3, kind: input, shape index: {}]   ;;  %s1773_s4 = inlined_call_operand.vmem [shape: f32[1,128], index: 4, kind: input, shape index: {}]   ;;  %s1774_s5 = inlined_call_operand.vmem [shape: f32[32,12], index: 5, kind: input, shape index: {}]   ;;  %s1775_s6 = inlined_call_operand.vmem [shape: f32[1,12], index: 6, kind: input, shape index: {}]   ;;  %s1776_s7 = inlined_call_operand.vmem [shape: f32[12,12], index: 7, kind: input, shape index: {}]   ;;  %s1777_s8 = inlined_call_operand.vmem [shape: f32[2,12], index: 8, kind: output, shape index: {}]  }
   0x1   :  { %s24_s29 = sshll.u32 %s1772_s3, 4  ;;  %s26_s9 = sshll.u32 %s1419_s30, 4  ;;  %s25_s29 = int_to_ptr.hbm [resolvable:$true] %s24_s29  ;;  %s27_s9 = int_to_ptr.vmem [resolvable:$true] %s26_s9 }
   0x2   :  { %s1421_s11 = smov 8  }
   0x3   :  { %32 = dma.hbm_to_vmem [thread:$0]  %s25_s29, 1024, %s27_s9, [#allocation3], %s1420_s10, %s1420_s10, %s1421_s11  }
   0x4   :  { %1417 = dma.done.wait [#allocation3], 1024  }
   0x5   :  { %1418 = vsyncadd [#allocation3], 4294966272  ;;  %v49_v0 = vld [vmem:[%s1770_s1 + $0x8] sm:$0xff]  ;;  %v48_v1 = vld [vmem:[%s1770_s1] sm:$0xff]  ;;  %vm54_vm0 = vcmask 130048   ;;  %s1422_s1 = smov 64  }
   0x6   :  { %75 = vmatpush.msra.mxu0 %v49_v0  ;;  %v46_v2 = vld [vmem:[%s1769_s0] sm:$0xff]  ;;  %v1205_v26 = vld [vmem:[#allocation2 + $0x30] sm:$0xf]  ;;  %v1251_v27 = vld [vmem:[#allocation2 + $0x34] sm:$0xf0]  ;;  %vm134_vm5 = vcmask 261120  }
   0x7   :  { %v1485_v3 = vld [vmem:[%s1771_s2] ss:$0 sm:$0xff]  ;;  %s1423_s2 = smov 32   ;;  %v1250_v28 = vld [vmem:[#allocation2 + $0x34] sm:$0xf]  ;;  %v1498_v29 = vor.u32 %v1251_v27, %v1205_v26  ;;  %vm177_vm6 = vcmask 523264  }
   0x8   :  { %76 = vmatpush.msra.mxu0 %v48_v1  ;;  %v1207_v30 = vld [vmem:[#allocation2 + $0x38] sm:$0xf0]  ;;  %v1197_v31 = vld [vmem:[#allocation2 + $0x20] sm:$0xf]  ;;  %v1249_v32 = vld [vmem:[#allocation2 + $0x24] sm:$0xf0] }
   0x9   :  { %1176 = vmatmul.msk.f32.vlgmr.msra.gmra.mxu0 %vm54_vm0, %v46_v2  ;;  %v1500_v33 = vor.u32 %v1250_v28, %v1207_v30  ;;  %v1248_v34 = vld [vmem:[#allocation2 + $0x24] sm:$0xf]  ;;  %v1199_v35 = vld [vmem:[#allocation2 + $0x28] sm:$0xf0]  ;;  %185 = vmatpush.bf16.msra.mxu1 %v1498_v29  ;;  %v1503_v36 = vor.u32 %v1249_v32, %v1197_v31  ;;  %v1189_v38 = vld [vmem:[#allocation2 + $0x10] sm:$0xf] }
   0xa   :  { %312 = vmatpush.bf16.msra.mxu3 %v1498_v29  ;;  %v1507_v37 = vor.u32 %v1248_v34, %v1199_v35  ;;  %v1247_v39 = vld [vmem:[#allocation2 + $0x14] sm:$0xf0]  ;;  %v1246_v40 = vld [vmem:[#allocation2 + $0x14] sm:$0xf]  ;;  %v1191_v41 = vld [vmem:[#allocation2 + $0x18] sm:$0xf0] }
   0xb   :  { %198 = vmatpush.bf16.msra.mxu2 %v1500_v33  ;;  %325 = vmatpush.bf16.msrb.mxu0 %v1500_v33  ;;  %v1511_v42 = vor.u32 %v1247_v39, %v1189_v38  ;;  %v1515_v43 = vor.u32 %v1246_v40, %v1191_v41  ;;  %v1181_v46 = vld [vmem:[#allocation2] sm:$0xf]  ;;  %v1245_v47 = vld [vmem:[#allocation2 + $0x4] sm:$0xf0]  ;;  %v1244_v48 = vld [vmem:[#allocation2 + $0x4] sm:$0xf] }
   0xc   :  { %v1523_v49 = vor.u32 %v1245_v47, %v1181_v46  ;;  %v1183_v50 = vld [vmem:[#allocation2 + $0x8] sm:$0xf0]  ;;  %v1561_v56 = vld [vmem:[%s1773_s4] ss:$0 sm:$0xff] }
   0xd   :  { %186 = vmatpush.bf16.msra.mxu1 %v1503_v36  ;;  %v1525_v51 = vor.u32 %v1244_v48, %v1183_v50 }
   0xe   :  { %313 = vmatpush.bf16.msra.mxu3 %v1503_v36 }
   0xf   :  { %199 = vmatpush.bf16.msra.mxu2 %v1507_v37  ;;  %326 = vmatpush.bf16.msrb.mxu0 %v1507_v37 }
  0x11   :  { %187 = vmatpush.bf16.msra.mxu1 %v1511_v42 }
  0x12   :  { %314 = vmatpush.bf16.msra.mxu3 %v1511_v42 }
  0x13   :  { %200 = vmatpush.bf16.msra.mxu2 %v1515_v43  ;;  %327 = vmatpush.bf16.msrb.mxu0 %v1515_v43 }
  0x15   :  { %188 = vmatpush.bf16.msra.mxu1 %v1523_v49 }
  0x16   :  { %315 = vmatpush.bf16.msra.mxu3 %v1523_v49 }
  0x17   :  { %201 = vmatpush.bf16.msra.mxu2 %v1525_v51  ;;  %328 = vmatpush.bf16.msrb.mxu0 %v1525_v51 }
  0x19   :  { %436 = vmatpush.bf16.msrb.mxu1 %v1498_v29 }
  0x1a   :  { %560 = vmatpush.bf16.msrb.mxu3 %v1498_v29 }
  0x1b   :  { %449 = vmatpush.bf16.msrb.mxu2 %v1500_v33  ;;  %573 = vmatpush.bf16.msra.mxu0 %v1500_v33 }
  0x1d   :  { %437 = vmatpush.bf16.msrb.mxu1 %v1503_v36 }
  0x1e   :  { %561 = vmatpush.bf16.msrb.mxu3 %v1503_v36 }
  0x1f   :  { %450 = vmatpush.bf16.msrb.mxu2 %v1507_v37  ;;  %574 = vmatpush.bf16.msra.mxu0 %v1507_v37 }
  0x21   :  { %438 = vmatpush.bf16.msrb.mxu1 %v1511_v42 }
  0x22   :  { %562 = vmatpush.bf16.msrb.mxu3 %v1511_v42 }
  0x23   :  { %451 = vmatpush.bf16.msrb.mxu2 %v1515_v43  ;;  %575 = vmatpush.bf16.msra.mxu0 %v1515_v43 }
  0x25   :  { %439 = vmatpush.bf16.msrb.mxu1 %v1523_v49 }
  0x26   :  { %563 = vmatpush.bf16.msrb.mxu3 %v1523_v49 }
  0x27   :  { %452 = vmatpush.bf16.msrb.mxu2 %v1525_v51  ;;  %576 = vmatpush.bf16.msra.mxu0 %v1525_v51 }
  0x86   :  { %v78_v4 = vpop.f32.mrf.mxu0 }
  0x87   :  { %v1488_v5 = vadd.f32 %v1485_v3, %v78_v4 }
  0x89   :  { %1260 = vtanh.f32 %v1488_v5  ;;  %v1178_v7 = vmul.f32 -1.442695, %v1488_v5 }
  0x8b   :  { %1262 = vpow2.f32 %v1178_v7 }
  0x8f   :  { %v1261_v6 = vpop.eup %1260 }
  0x90   :  { %115 = vrot.lane.b32.xlu0 %v1261_v6, %s1422_s1 }
  0x91   :  { %v1263_v8 = vpop.eup %1262 }
  0x92   :  { %v96_v9 = vadd.f32 1.0, %v1263_v8 }
  0x94   :  { %1264 = vrcp.f32 %v96_v9  ;;  %v108_v15 = vand.u32 2147483648, %v96_v9  ;;  %vm102_vm2 = vweird.f32 %v96_v9  ;;  %v106_v16 = vand.u32 2147483647, %v96_v9 }
  0x96   :  { %v109_v18 = vor.u32 1.1754944e-38, %v108_v15  ;;  %vm107_vm4 = vcmp.eq.f32.partialorder %v106_v16, 8.507059e+37 }
  0x9a   :  { %v1265_v10 = vpop.eup %1264 }
  0x9b   :  { %v98_v11 = vmul.f32 %v1265_v10, %v96_v9  ;;  %vm103_vm1 = vweird.f32 %v1265_v10 }
  0x9c   :  { %vm104_vm3 = vmor %vm102_vm2, %vm103_vm1 }
  0x9d   :  { %v99_v12 = vsub.f32 1.0, %v98_v11 }
  0x9f   :  { %v100_v13 = vmul.f32 %v1265_v10, %v99_v12 }
  0xa1   :  { %v101_v14 = vadd.f32 %v1265_v10, %v100_v13 }
  0xa3   :  { %v105_v17 = vsel %vm104_vm3, %v1265_v10, %v101_v14 }
  0xa4   :  { %v110_v20 = vsel %vm107_vm4, %v109_v18, %v105_v17 }
  0xa5   :  { %v113_v22 = vmul.f32 0.0, %v110_v20 }
 0x102   :  { %v116_v19 = vpop.permute.xlu0 %115 }
 0x103   :  { %v118_v21 = vmul.f32 %v116_v19, %v110_v20 }
 0x105   :  { %120 = vrot.lane.b32.xlu0 %v118_v21, %s1423_s2 }
 0x177   :  { %v121_v23 = vpop.permute.xlu0 %120 }
 0x178   :  { %v1494_v24 = vadd.f32 %v121_v23, %v113_v22 }
 0x17a   :  { %1266 = vtanh.f32 %v1494_v24  ;;  %v273_v41 = vrot.slane %v1494_v24, 6  ;;  %v47_v24 = vld [vmem:[%s1769_s0 + $0x8] sm:$0xff] }
 0x17b   :  { %1177 = vmatmul.msk.f32.gmra.mxu0 %vm54_vm0, %v47_v24 }
 0x180   :  { %v1267_v25 = vpop.eup %1266 }
 0x181   :  { %126 = vrot.lane.b32.xlu1 %v1267_v25, %s1422_s1 }
 0x1f3   :  { %v127_v44 = vpop.permute.xlu1 %126 }
 0x1f4   :  { %v129_v45 = vmul.f32 %v127_v44, %v110_v20 }
 0x1f6   :  { %131 = vrot.lane.b32.xlu1 %v129_v45, %s1423_s2 }
 0x268   :  { %v132_v52 = vpop.permute.xlu1 %131 }
 0x269   :  { %v135_v53 = vsel %vm134_vm5, %v132_v52, 0.0 }
 0x26a   :  { %v136_v54 = vpack.c.bf16 %v135_v53, %v135_v53 }
 0x26c   :  { %1211 = vmatmul.msk.bf16.vlgmr.msra.gmra.mxu1 %vm177_vm6, %v136_v54  ;;  %1212 = vmatmul.msk.bf16.vlgmr.msra.gmra.mxu2 %vm177_vm6, %v136_v54 }
 0x26d   :  { %691 = vmatpush.bf16.msra.mxu2 %v1500_v33  ;;  %678 = vmatpush.bf16.msra.mxu1 %v1498_v29 }
 0x271   :  { %692 = vmatpush.bf16.msra.mxu2 %v1507_v37  ;;  %679 = vmatpush.bf16.msra.mxu1 %v1503_v36 }
 0x275   :  { %693 = vmatpush.bf16.msra.mxu2 %v1515_v43  ;;  %680 = vmatpush.bf16.msra.mxu1 %v1511_v42 }
 0x279   :  { %694 = vmatpush.bf16.msra.mxu2 %v1525_v51  ;;  %681 = vmatpush.bf16.msra.mxu1 %v1523_v49 }
 0x2e9   :  { %v190_v55 = vpop.f32.mrf.mxu1 }
 0x2ea   :  { %v249_v60 = vrot.slane %v190_v55, 6 }
 0x2ec   :  { %v251_v61 = vadd.f32 %v249_v60, %v1488_v5 }
 0x2ee   :  { %v1214_v2 = vmul.f32 -1.442695, %v251_v61 }
 0x2ef   :  { %v203_v57 = vpop.f32.mrf.mxu2 }
 0x2f0   :  { %v210_v58 = vadd.f32 %v1561_v56, %v203_v57 }
 0x2f1   :  { %v192_v59 = vpop.f32.mrf.mxu1 }
 0x2f2   :  { %1268 = vtanh.f32 %v210_v58  ;;  %v1213_v1 = vmul.f32 -1.442695, %v210_v58 }
 0x2f3   :  { %1270 = vtanh.f32 %v251_v61 }
 0x2f4   :  { %1272 = vpow2.f32 %v1213_v1 }
 0x2f5   :  { %1274 = vpow2.f32 %v1214_v2 }
 0x2f7   :  { %v205_v62 = vpop.f32.mrf.mxu2 }
 0x2f8   :  { %v1269_v63 = vpop.eup %1268  ;;  %v1595_v62 = vpop.f32.mrf.mxu0 }
 0x2f9   :  { %233 = vrot.lane.b32.xlu2 %v1269_v63, %s1422_s1  ;;  %v1271_v0 = vpop.eup %1270 }
 0x2fa   :  { %v1273_v4 = vpop.eup %1272 }
 0x2fb   :  { %v214_v6 = vadd.f32 1.0, %v1273_v4  ;;  %v1275_v7 = vpop.eup %1274 }
 0x2fc   :  { %v255_v8 = vadd.f32 1.0, %v1275_v7 }
 0x2fd   :  { %1276 = vrcp.f32 %v214_v6  ;;  %v226_v17 = vand.u32 2147483648, %v214_v6  ;;  %vm220_vm8 = vweird.f32 %v214_v6  ;;  %v224_v18 = vand.u32 2147483647, %v214_v6 }
 0x2fe   :  { %1278 = vrcp.f32 %v255_v8  ;;  %v267_v27 = vand.u32 2147483648, %v255_v8  ;;  %vm261_vm12 = vweird.f32 %v255_v8  ;;  %v265_v28 = vand.u32 2147483647, %v255_v8 }
 0x2ff   :  { %v227_v21 = vor.u32 1.1754944e-38, %v226_v17  ;;  %vm225_vm10 = vcmp.eq.f32.partialorder %v224_v18, 8.507059e+37 }
 0x300   :  { %v268_v31 = vor.u32 1.1754944e-38, %v267_v27  ;;  %vm266_vm14 = vcmp.eq.f32.partialorder %v265_v28, 8.507059e+37 }
 0x301   :  { %277 = vrot.lane.b32.xlu2 %v1271_v0, %s1422_s1 }
 0x303   :  { %v1277_v9 = vpop.eup %1276 }
 0x304   :  { %v216_v10 = vmul.f32 %v1277_v9, %v214_v6  ;;  %v1279_v12 = vpop.eup %1278  ;;  %vm221_vm7 = vweird.f32 %v1277_v9 }
 0x305   :  { %v257_v14 = vmul.f32 %v1279_v12, %v255_v8  ;;  %vm222_vm9 = vmor %vm220_vm8, %vm221_vm7  ;;  %vm262_vm11 = vweird.f32 %v1279_v12 }
 0x306   :  { %v217_v11 = vsub.f32 1.0, %v216_v10  ;;  %vm263_vm13 = vmor %vm261_vm12, %vm262_vm11 }
 0x307   :  { %v258_v16 = vsub.f32 1.0, %v257_v14 }
 0x308   :  { %v218_v13 = vmul.f32 %v1277_v9, %v217_v11 }
 0x309   :  { %v259_v20 = vmul.f32 %v1279_v12, %v258_v16 }
 0x30a   :  { %v219_v15 = vadd.f32 %v1277_v9, %v218_v13 }
 0x30b   :  { %v260_v26 = vadd.f32 %v1279_v12, %v259_v20 }
 0x30c   :  { %v223_v19 = vsel %vm222_vm9, %v1277_v9, %v219_v15 }
 0x30d   :  { %v228_v23 = vsel %vm225_vm10, %v227_v21, %v223_v19  ;;  %v264_v30 = vsel %vm263_vm13, %v1279_v12, %v260_v26 }
 0x30e   :  { %v269_v34 = vsel %vm266_vm14, %v268_v31, %v264_v30  ;;  %v231_v38 = vmul.f32 0.0, %v228_v23 }
 0x30f   :  { %v275_v44 = vmul.f32 %v273_v41, %v269_v34 }
 0x353   :  { %v234_v22 = vpop.permute.xlu2 %233 }
 0x354   :  { %v236_v25 = vmul.f32 %v234_v22, %v228_v23 }
 0x356   :  { %238 = vrot.lane.b32.xlu0 %v236_v25, %s1423_s2 }
 0x35b   :  { %v278_v32 = vpop.permute.xlu2 %277 }
 0x35c   :  { %v280_v35 = vmul.f32 %v278_v32, %v269_v34 }
 0x35e   :  { %282 = vrot.lane.b32.xlu1 %v280_v35, %s1423_s2 }
 0x3c8   :  { %v239_v39 = vpop.permute.xlu0 %238 }
 0x3c9   :  { %v1569_v40 = vadd.f32 %v239_v39, %v231_v38 }
 0x3cb   :  { %1280 = vtanh.f32 %v1569_v40 }
 0x3d0   :  { %v283_v45 = vpop.permute.xlu1 %282 }
 0x3d1   :  { %v1281_v46 = vpop.eup %1280  ;;  %v1573_v47 = vadd.f32 %v283_v45, %v275_v44 }
 0x3d2   :  { %244 = vrot.lane.b32.xlu2 %v1281_v46, %s1422_s1 }
 0x3d3   :  { %1282 = vtanh.f32 %v1573_v47 }
 0x3d9   :  { %v1283_v48 = vpop.eup %1282 }
 0x3da   :  { %288 = vrot.lane.b32.xlu0 %v1283_v48, %s1422_s1 }
 0x42c   :  { %v245_v50 = vpop.permute.xlu2 %244 }
 0x42d   :  { %v247_v52 = vmul.f32 %v245_v50, %v228_v23 }
 0x42f   :  { %v297_v53 = vrot.slane %v247_v52, 6 }
 0x431   :  { %298 = vrot.lane.b32.xlu2 %v297_v53, %s1422_s1 }
 0x44c   :  { %v289_v54 = vpop.permute.xlu0 %288 }
 0x44d   :  { %v291_v55 = vmul.f32 %v289_v54, %v269_v34 }
 0x44f   :  { %293 = vrot.lane.b32.xlu1 %v291_v55, %s1423_s2  ;;  %v397_v55 = vrot.slane %v1573_v47, 6 }
 0x48b   :  { %v299_v57 = vpop.permute.xlu2 %298 }
 0x4c1   :  { %v294_v58 = vpop.permute.xlu1 %293 }
 0x4c2   :  { %v301_v59 = vsel %vm134_vm5, %v294_v58, %v299_v57 }
 0x4c3   :  { %v302_v60 = vpack.c.bf16 %v301_v59, %v301_v59 }
 0x4c5   :  { %v304_v61 = vrot.slane %v302_v60, 1 }
 0x4c7   :  { %1215 = vmatmul.msk.bf16.vlgmr.msra.gmra.mxu3 %vm177_vm6, %v304_v61  ;;  %1216 = vmatmul.msk.bf16.vlgmr.msrb.gmra.mxu0 %vm177_vm6, %v304_v61 }
 0x4c8   :  { %815 = vmatpush.bf16.msrb.mxu0 %v1500_v33  ;;  %802 = vmatpush.bf16.msra.mxu3 %v1498_v29 }
 0x4cc   :  { %816 = vmatpush.bf16.msrb.mxu0 %v1507_v37  ;;  %803 = vmatpush.bf16.msra.mxu3 %v1503_v36 }
 0x4d0   :  { %817 = vmatpush.bf16.msrb.mxu0 %v1515_v43  ;;  %804 = vmatpush.bf16.msra.mxu3 %v1511_v42 }
 0x4d4   :  { %818 = vmatpush.bf16.msrb.mxu0 %v1525_v51  ;;  %805 = vmatpush.bf16.msra.mxu3 %v1523_v49 }
 0x544   :  { %v330_v63 = vpop.f32.mrf.mxu0 }
 0x545   :  { %v334_v0 = vadd.f32 %v1561_v56, %v330_v63 }
 0x547   :  { %1284 = vtanh.f32 %v334_v0  ;;  %v1217_v10 = vmul.f32 -1.442695, %v334_v0 }
 0x54a   :  { %v317_v1 = vpop.f32.mrf.mxu3 }
 0x54b   :  { %v373_v2 = vrot.slane %v317_v1, 4 }
 0x54c   :  { %v332_v4 = vpop.f32.mrf.mxu0 }
 0x54d   :  { %v1285_v6 = vpop.eup %1284  ;;  %v375_v7 = vadd.f32 %v373_v2, %v1488_v5 }
 0x54e   :  { %357 = vrot.lane.b32.xlu0 %v1285_v6, %s1422_s1 }
 0x54f   :  { %1286 = vtanh.f32 %v375_v7  ;;  %v1218_v11 = vmul.f32 -1.442695, %v375_v7 }
 0x550   :  { %1288 = vpow2.f32 %v1217_v10 }
 0x551   :  { %1290 = vpow2.f32 %v1218_v11 }
 0x552   :  { %v319_v8 = vpop.f32.mrf.mxu3 }
 0x555   :  { %v1287_v9 = vpop.eup %1286 }
 0x556   :  { %401 = vrot.lane.b32.xlu1 %v1287_v9, %s1422_s1  ;;  %v1289_v12 = vpop.eup %1288 }
 0x557   :  { %v338_v13 = vadd.f32 1.0, %v1289_v12  ;;  %v1291_v14 = vpop.eup %1290 }
 0x558   :  { %v379_v15 = vadd.f32 1.0, %v1291_v14 }
 0x559   :  { %1292 = vrcp.f32 %v338_v13  ;;  %v350_v25 = vand.u32 2147483648, %v338_v13  ;;  %vm344_vm0 = vweird.f32 %v338_v13  ;;  %v348_v26 = vand.u32 2147483647, %v338_v13 }
 0x55a   :  { %1294 = vrcp.f32 %v379_v15  ;;  %v391_v38 = vand.u32 2147483648, %v379_v15  ;;  %vm385_vm4 = vweird.f32 %v379_v15  ;;  %v389_v39 = vand.u32 2147483647, %v379_v15 }
 0x55b   :  { %v351_v30 = vor.u32 1.1754944e-38, %v350_v25  ;;  %vm349_vm2 = vcmp.eq.f32.partialorder %v348_v26, 8.507059e+37 }
 0x55c   :  { %v392_v44 = vor.u32 1.1754944e-38, %v391_v38  ;;  %vm390_vm8 = vcmp.eq.f32.partialorder %v389_v39, 8.507059e+37 }
 0x55f   :  { %v1293_v16 = vpop.eup %1292 }
 0x560   :  { %v340_v17 = vmul.f32 %v1293_v16, %v338_v13  ;;  %v1295_v19 = vpop.eup %1294  ;;  %vm345_vm15 = vweird.f32 %v1293_v16 }
 0x561   :  { %v381_v21 = vmul.f32 %v1295_v19, %v379_v15  ;;  %vm346_vm1 = vmor %vm344_vm0, %vm345_vm15  ;;  %vm386_vm3 = vweird.f32 %v1295_v19 }
 0x562   :  { %v341_v18 = vsub.f32 1.0, %v340_v17  ;;  %vm387_vm7 = vmor %vm385_vm4, %vm386_vm3 }
 0x563   :  { %v382_v23 = vsub.f32 1.0, %v381_v21 }
 0x564   :  { %v342_v20 = vmul.f32 %v1293_v16, %v341_v18 }
 0x565   :  { %v383_v28 = vmul.f32 %v1295_v19, %v382_v23 }
 0x566   :  { %v343_v22 = vadd.f32 %v1293_v16, %v342_v20 }
 0x567   :  { %v384_v35 = vadd.f32 %v1295_v19, %v383_v28 }
 0x568   :  { %v347_v27 = vsel %vm346_vm1, %v1293_v16, %v343_v22 }
 0x569   :  { %v352_v32 = vsel %vm349_vm2, %v351_v30, %v347_v27  ;;  %v388_v41 = vsel %vm387_vm7, %v1295_v19, %v384_v35 }
 0x56a   :  { %v393_v46 = vsel %vm390_vm8, %v392_v44, %v388_v41  ;;  %v355_v50 = vmul.f32 %v352_v32, %v1569_v40 }
 0x56b   :  { %v399_v24 = vmul.f32 %v397_v55, %v393_v46 }
 0x5c0   :  { %v358_v31 = vpop.permute.xlu0 %357 }
 0x5c1   :  { %v360_v34 = vmul.f32 %v358_v31, %v352_v32 }
 0x5c3   :  { %362 = vrot.lane.b32.xlu2 %v360_v34, %s1423_s2 }
 0x5c8   :  { %v402_v45 = vpop.permute.xlu1 %401 }
 0x5c9   :  { %v404_v48 = vmul.f32 %v402_v45, %v393_v46 }
 0x5cb   :  { %406 = vrot.lane.b32.xlu0 %v404_v48, %s1423_s2 }
 0x61d   :  { %v363_v52 = vpop.permute.xlu2 %362 }
 0x61e   :  { %v1604_v53 = vadd.f32 %v363_v52, %v355_v50 }
 0x620   :  { %1296 = vtanh.f32 %v1604_v53 }
 0x626   :  { %v1297_v54 = vpop.eup %1296 }
 0x627   :  { %368 = vrot.lane.b32.xlu1 %v1297_v54, %s1422_s1 }
 0x63d   :  { %v407_v57 = vpop.permute.xlu0 %406 }
 0x63e   :  { %v1609_v58 = vadd.f32 %v407_v57, %v399_v24 }
 0x640   :  { %1298 = vtanh.f32 %v1609_v58  ;;  %v521_v52 = vrot.slane %v1609_v58, 6 }
 0x646   :  { %v1299_v59 = vpop.eup %1298 }
 0x647   :  { %412 = vrot.lane.b32.xlu2 %v1299_v59, %s1422_s1 }
 0x699   :  { %v369_v40 = vpop.permute.xlu1 %368 }
 0x69a   :  { %v371_v60 = vmul.f32 %v369_v40, %v352_v32 }
 0x69c   :  { %v421_v61 = vrot.slane %v371_v60, 4 }
 0x69e   :  { %422 = vrot.lane.b32.xlu1 %v421_v61, %s1422_s1 }
 0x6a1   :  { %v413_v63 = vpop.permute.xlu2 %412 }
 0x6a2   :  { %v415_v0 = vmul.f32 %v413_v63, %v393_v46 }
 0x6a4   :  { %417 = vrot.lane.b32.xlu0 %v415_v0, %s1423_s2 }
 0x710   :  { %v423_v1 = vpop.permute.xlu1 %422 }
 0x716   :  { %v418_v47 = vpop.permute.xlu0 %417 }
 0x717   :  { %v425_v2 = vsel %vm134_vm5, %v418_v47, %v423_v1 }
 0x718   :  { %v426_v4 = vpack.c.bf16 %v425_v2, %v425_v2 }
 0x71a   :  { %v428_v6 = vrot.slane %v426_v4, 2 }
 0x71c   :  { %1219 = vmatmul.msk.bf16.vlgmr.msrb.gmra.mxu1 %vm177_vm6, %v428_v6  ;;  %1220 = vmatmul.msk.bf16.vlgmr.msrb.gmra.mxu2 %vm177_vm6, %v428_v6 }
 0x71d   :  { %926 = vmatpush.bf16.msrb.mxu1 %v1498_v29  ;;  %939 = vmatpush.bf16.msrb.mxu2 %v1500_v33 }
 0x721   :  { %927 = vmatpush.bf16.msrb.mxu1 %v1503_v36  ;;  %940 = vmatpush.bf16.msrb.mxu2 %v1507_v37 }
 0x725   :  { %928 = vmatpush.bf16.msrb.mxu1 %v1511_v42  ;;  %941 = vmatpush.bf16.msrb.mxu2 %v1515_v43 }
 0x729   :  { %929 = vmatpush.bf16.msrb.mxu1 %v1523_v49  ;;  %942 = vmatpush.bf16.msrb.mxu2 %v1525_v51 }
 0x799   :  { %v441_v7 = vpop.f32.mrf.mxu1 }
 0x79a   :  { %v497_v8 = vrot.slane %v441_v7, 2 }
 0x79c   :  { %v499_v9 = vadd.f32 %v497_v8, %v1488_v5 }
 0x79e   :  { %1300 = vtanh.f32 %v499_v9  ;;  %v1222_v15 = vmul.f32 -1.442695, %v499_v9 }
 0x79f   :  { %v454_v29 = vpop.f32.mrf.mxu2 }
 0x7a0   :  { %v458_v10 = vadd.f32 %v1561_v56, %v454_v29  ;;  %v1654_v29 = vadd.f32 %v1485_v3, %v1595_v62 }
 0x7a1   :  { %v443_v11 = vpop.f32.mrf.mxu1 }
 0x7a2   :  { %1302 = vtanh.f32 %v458_v10  ;;  %v1221_v49 = vmul.f32 -1.442695, %v458_v10 }
 0x7a4   :  { %v1301_v36 = vpop.eup %1300  ;;  %1304 = vpow2.f32 %v1221_v49 }
 0x7a5   :  { %525 = vrot.lane.b32.xlu0 %v1301_v36, %s1422_s1 }
 0x7a7   :  { %v456_v42 = vpop.f32.mrf.mxu2 }
 0x7a8   :  { %v1303_v12 = vpop.eup %1302 }
 0x7a9   :  { %481 = vrot.lane.b32.xlu2 %v1303_v12, %s1422_s1 }
 0x7aa   :  { %v1305_v13 = vpop.eup %1304 }
 0x7ab   :  { %v462_v14 = vadd.f32 1.0, %v1305_v13 }
 0x7ad   :  { %1306 = vrcp.f32 %v462_v14  ;;  %v474_v22 = vand.u32 2147483648, %v462_v14  ;;  %vm468_vm10 = vweird.f32 %v462_v14  ;;  %v472_v23 = vand.u32 2147483647, %v462_v14 }
 0x7ae   :  { %1308 = vpow2.f32 %v1222_v15 }
 0x7af   :  { %v475_v27 = vor.u32 1.1754944e-38, %v474_v22  ;;  %vm473_vm12 = vcmp.eq.f32.partialorder %v472_v23, 8.507059e+37 }
 0x7b3   :  { %v1307_v5 = vpop.eup %1306 }
 0x7b4   :  { %v464_v16 = vmul.f32 %v1307_v5, %v462_v14  ;;  %v1309_v17 = vpop.eup %1308  ;;  %vm469_vm9 = vweird.f32 %v1307_v5 }
 0x7b5   :  { %v503_v19 = vadd.f32 1.0, %v1309_v17  ;;  %vm470_vm11 = vmor %vm468_vm10, %vm469_vm9 }
 0x7b6   :  { %v465_v18 = vsub.f32 1.0, %v464_v16 }
 0x7b7   :  { %1310 = vrcp.f32 %v503_v19  ;;  %v515_v39 = vand.u32 2147483648, %v503_v19  ;;  %vm509_vm14 = vweird.f32 %v503_v19  ;;  %v513_v41 = vand.u32 2147483647, %v503_v19 }
 0x7b8   :  { %v466_v20 = vmul.f32 %v1307_v5, %v465_v18 }
 0x7b9   :  { %v516_v45 = vor.u32 1.1754944e-38, %v515_v39  ;;  %vm514_vm0 = vcmp.eq.f32.partialorder %v513_v41, 8.507059e+37 }
 0x7ba   :  { %v467_v21 = vadd.f32 %v1307_v5, %v466_v20 }
 0x7bc   :  { %v471_v25 = vsel %vm470_vm11, %v1307_v5, %v467_v21 }
 0x7bd   :  { %v1311_v26 = vpop.eup %1310  ;;  %v476_v30 = vsel %vm473_vm12, %v475_v27, %v471_v25 }
 0x7be   :  { %v505_v32 = vmul.f32 %v1311_v26, %v503_v19  ;;  %vm510_vm13 = vweird.f32 %v1311_v26  ;;  %v479_v57 = vmul.f32 %v476_v30, %v1604_v53 }
 0x7bf   :  { %vm511_vm15 = vmor %vm509_vm14, %vm510_vm13 }
 0x7c0   :  { %v506_v34 = vsub.f32 1.0, %v505_v32 }
 0x7c2   :  { %v507_v35 = vmul.f32 %v1311_v26, %v506_v34 }
 0x7c4   :  { %v508_v38 = vadd.f32 %v1311_v26, %v507_v35 }
 0x7c6   :  { %v512_v44 = vsel %vm511_vm15, %v1311_v26, %v508_v38 }
 0x7c7   :  { %v517_v48 = vsel %vm514_vm0, %v516_v45, %v512_v44 }
 0x7c8   :  { %v523_v54 = vmul.f32 %v521_v52, %v517_v48 }
 0x803   :  { %v482_v28 = vpop.permute.xlu2 %481 }
 0x804   :  { %v484_v31 = vmul.f32 %v482_v28, %v476_v30 }
 0x806   :  { %486 = vrot.lane.b32.xlu1 %v484_v31, %s1423_s2 }
 0x817   :  { %v526_v46 = vpop.permute.xlu0 %525 }
 0x818   :  { %v528_v50 = vmul.f32 %v526_v46, %v517_v48 }
 0x81a   :  { %530 = vrot.lane.b32.xlu2 %v528_v50, %s1423_s2 }
 0x874   :  { %v531_v55 = vpop.permute.xlu2 %530 }
 0x875   :  { %v1633_v24 = vadd.f32 %v531_v55, %v523_v54 }
 0x877   :  { %1312 = vtanh.f32 %v1633_v24  ;;  %v642_v44 = vrot.slane %v1633_v24, 6 }
 0x878   :  { %v487_v59 = vpop.permute.xlu1 %486 }
 0x879   :  { %v1637_v40 = vadd.f32 %v487_v59, %v479_v57 }
 0x87b   :  { %1314 = vtanh.f32 %v1637_v40 }
 0x87d   :  { %v1313_v60 = vpop.eup %1312 }
 0x87e   :  { %536 = vrot.lane.b32.xlu1 %v1313_v60, %s1422_s1 }
 0x881   :  { %v1315_v61 = vpop.eup %1314 }
 0x882   :  { %492 = vrot.lane.b32.xlu0 %v1315_v61, %s1422_s1 }
 0x8f0   :  { %v537_v58 = vpop.permute.xlu1 %536 }
 0x8f1   :  { %v539_v63 = vmul.f32 %v537_v58, %v517_v48 }
 0x8f3   :  { %541 = vrot.lane.b32.xlu2 %v539_v63, %s1423_s2 }
 0x8f4   :  { %v493_v0 = vpop.permute.xlu0 %492 }
 0x8f5   :  { %v495_v1 = vmul.f32 %v493_v0, %v476_v30 }
 0x8f7   :  { %v545_v47 = vrot.slane %v495_v1, 2 }
 0x8f9   :  { %546 = vrot.lane.b32.xlu0 %v545_v47, %s1422_s1 }
 0x94d   :  { %v542_v53 = vpop.permute.xlu2 %541 }
 0x96b   :  { %v547_v2 = vpop.permute.xlu0 %546 }
 0x96c   :  { %v549_v4 = vsel %vm134_vm5, %v542_v53, %v547_v2 }
 0x96d   :  { %v550_v6 = vpack.c.bf16 %v549_v4, %v549_v4 }
 0x96f   :  { %v552_v7 = vrot.slane %v550_v6, 3 }
 0x971   :  { %1223 = vmatmul.msk.bf16.vlgmr.msrb.gmra.mxu3 %vm177_vm6, %v552_v7  ;;  %1224 = vmatmul.msk.bf16.vlgmr.msra.gmra.mxu0 %vm177_vm6, %v552_v7 }
 0x972   :  { %1050 = vmatpush.bf16.msrb.mxu3 %v1500_v33 }
 0x976   :  { %1051 = vmatpush.bf16.msrb.mxu3 %v1507_v37 }
 0x97a   :  { %1052 = vmatpush.bf16.msrb.mxu3 %v1515_v43 }
 0x97e   :  { %1053 = vmatpush.bf16.msrb.mxu3 %v1525_v51 }
 0x9ee   :  { %v578_v8 = vpop.f32.mrf.mxu0 }
 0x9ef   :  { %v582_v9 = vadd.f32 %v1561_v56, %v578_v8 }
 0x9f1   :  { %1316 = vtanh.f32 %v582_v9  ;;  %v1225_v49 = vmul.f32 -1.442695, %v582_v9 }
 0x9f4   :  { %v565_v10 = vpop.f32.mrf.mxu3 }
 0x9f5   :  { %v620_v11 = vadd.f32 %v565_v10, %v1654_v29 }
 0x9f6   :  { %v580_v36 = vpop.f32.mrf.mxu0 }
 0x9f7   :  { %v1317_v42 = vpop.eup %1316  ;;  %1318 = vtanh.f32 %v620_v11  ;;  %v1226_v43 = vmul.f32 -1.442695, %v620_v11 }
 0x9f8   :  { %605 = vrot.lane.b32.xlu1 %v1317_v42, %s1422_s1 }
 0x9f9   :  { %1320 = vpow2.f32 %v1226_v43 }
 0x9fc   :  { %v567_v33 = vpop.f32.mrf.mxu3 }
 0x9fd   :  { %v1319_v37 = vpop.eup %1318 }
 0x9fe   :  { %646 = vrot.lane.b32.xlu2 %v1319_v37, %s1422_s1 }
 0x9ff   :  { %v1321_v51 = vpop.eup %1320 }
 0xa00   :  { %v624_v12 = vadd.f32 1.0, %v1321_v51 }
 0xa02   :  { %1322 = vrcp.f32 %v624_v12  ;;  %v636_v17 = vand.u32 2147483648, %v624_v12  ;;  %vm630_vm2 = vweird.f32 %v624_v12  ;;  %v634_v18 = vand.u32 2147483647, %v624_v12 }
 0xa03   :  { %1324 = vpow2.f32 %v1225_v49 }
 0xa04   :  { %v637_v21 = vor.u32 1.1754944e-38, %v636_v17  ;;  %vm635_vm4 = vcmp.eq.f32.partialorder %v634_v18, 8.507059e+37 }
 0xa08   :  { %v1323_v3 = vpop.eup %1322 }
 0xa09   :  { %v626_v62 = vmul.f32 %v1323_v3, %v624_v12  ;;  %v1325_v13 = vpop.eup %1324  ;;  %vm631_vm1 = vweird.f32 %v1323_v3 }
 0xa0a   :  { %v586_v15 = vadd.f32 1.0, %v1325_v13  ;;  %vm632_vm3 = vmor %vm630_vm2, %vm631_vm1 }
 0xa0b   :  { %v627_v14 = vsub.f32 1.0, %v626_v62 }
 0xa0c   :  { %1326 = vrcp.f32 %v586_v15  ;;  %v598_v31 = vand.u32 2147483648, %v586_v15  ;;  %vm592_vm8 = vweird.f32 %v586_v15  ;;  %v596_v32 = vand.u32 2147483647, %v586_v15 }
 0xa0d   :  { %v628_v5 = vmul.f32 %v1323_v3, %v627_v14 }
 0xa0e   :  { %v599_v35 = vor.u32 1.1754944e-38, %v598_v31  ;;  %vm597_vm10 = vcmp.eq.f32.partialorder %v596_v32, 8.507059e+37 }
 0xa0f   :  { %v629_v16 = vadd.f32 %v1323_v3, %v628_v5 }
 0xa11   :  { %v633_v20 = vsel %vm632_vm3, %v1323_v3, %v629_v16 }
 0xa12   :  { %v1327_v19 = vpop.eup %1326  ;;  %v638_v25 = vsel %vm635_vm4, %v637_v21, %v633_v20 }
 0xa13   :  { %v588_v22 = vmul.f32 %v1327_v19, %v586_v15  ;;  %vm593_vm7 = vweird.f32 %v1327_v19  ;;  %v644_v45 = vmul.f32 %v642_v44, %v638_v25 }
 0xa14   :  { %vm594_vm9 = vmor %vm592_vm8, %vm593_vm7 }
 0xa15   :  { %v589_v27 = vsub.f32 1.0, %v588_v22 }
 0xa17   :  { %v590_v28 = vmul.f32 %v1327_v19, %v589_v27 }
 0xa19   :  { %v591_v30 = vadd.f32 %v1327_v19, %v590_v28 }
 0xa1b   :  { %v595_v34 = vsel %vm594_vm9, %v1327_v19, %v591_v30 }
 0xa1c   :  { %v600_v39 = vsel %vm597_vm10, %v599_v35, %v595_v34 }
 0xa1d   :  { %v603_v52 = vmul.f32 %v600_v39, %v1637_v40 }
 0xa58   :  { %v647_v23 = vpop.permute.xlu2 %646 }
 0xa59   :  { %v649_v26 = vmul.f32 %v647_v23, %v638_v25 }
 0xa5b   :  { %651 = vrot.lane.b32.xlu1 %v649_v26, %s1423_s2 }
 0xa6a   :  { %v606_v38 = vpop.permute.xlu1 %605 }
 0xa6b   :  { %v608_v41 = vmul.f32 %v606_v38, %v600_v39 }
 0xa6d   :  { %610 = vrot.lane.b32.xlu0 %v608_v41, %s1423_s2 }
 0xacd   :  { %v652_v46 = vpop.permute.xlu1 %651 }
 0xace   :  { %v1662_v48 = vadd.f32 %v652_v46, %v644_v45 }
 0xad0   :  { %1328 = vtanh.f32 %v1662_v48 }
 0xad6   :  { %v1329_v50 = vpop.eup %1328 }
 0xad7   :  { %657 = vrot.lane.b32.xlu0 %v1329_v50, %s1422_s1 }
 0xadf   :  { %v611_v54 = vpop.permute.xlu0 %610 }
 0xae0   :  { %v1667_v55 = vadd.f32 %v611_v54, %v603_v52 }
 0xae2   :  { %1330 = vtanh.f32 %v1667_v55 }
 0xae8   :  { %v1331_v57 = vpop.eup %1330 }
 0xae9   :  { %616 = vrot.lane.b32.xlu2 %v1331_v57, %s1422_s1 }
 0xb43   :  { %v617_v24 = vpop.permute.xlu2 %616 }
 0xb44   :  { %v619_v59 = vmul.f32 %v617_v24, %v600_v39  ;;  %v763_v39 = vrot.slane %v1662_v48, 6 }
 0xb46   :  { %666 = vrot.lane.b32.xlu2 %v619_v59, %s1422_s1 }
 0xb49   :  { %v658_v60 = vpop.permute.xlu0 %657 }
 0xb4a   :  { %v660_v61 = vmul.f32 %v658_v60, %v638_v25 }
 0xb4c   :  { %662 = vrot.lane.b32.xlu1 %v660_v61, %s1423_s2 }
 0xba0   :  { %v667_v58 = vpop.permute.xlu2 %666 }
 0xbbe   :  { %v663_v63 = vpop.permute.xlu1 %662 }
 0xbbf   :  { %v669_v40 = vsel %vm134_vm5, %v663_v63, %v667_v58 }
 0xbc0   :  { %v670_v0 = vpack.c.bf16 %v669_v40, %v669_v40 }
 0xbc2   :  { %1227 = vmatmul.msk.bf16.vlgmr.msra.gmra.mxu1 %vm177_vm6, %v670_v0  ;;  %1228 = vmatmul.msk.bf16.vlgmr.msra.gmra.mxu2 %vm177_vm6, %v670_v0 }
 0xc3f   :  { %v683_v1 = vpop.f32.mrf.mxu1 }
 0xc40   :  { %v739_v47 = vrot.slane %v683_v1, 6 }
 0xc42   :  { %v741_v53 = vadd.f32 %v739_v47, %v1654_v29 }
 0xc44   :  { %1332 = vtanh.f32 %v741_v53  ;;  %v1230_v10 = vmul.f32 -1.442695, %v741_v53 }
 0xc45   :  { %v696_v2 = vpop.f32.mrf.mxu2 }
 0xc46   :  { %v700_v4 = vadd.f32 %v1561_v56, %v696_v2 }
 0xc47   :  { %v685_v6 = vpop.f32.mrf.mxu1 }
 0xc48   :  { %1334 = vtanh.f32 %v700_v4  ;;  %v1229_v11 = vmul.f32 -1.442695, %v700_v4 }
 0xc49   :  { %1336 = vpow2.f32 %v1230_v10 }
 0xc4a   :  { %v1333_v7 = vpop.eup %1332  ;;  %1338 = vpow2.f32 %v1229_v11 }
 0xc4b   :  { %767 = vrot.lane.b32.xlu1 %v1333_v7, %s1422_s1 }
 0xc4d   :  { %v698_v8 = vpop.f32.mrf.mxu2 }
 0xc4e   :  { %v1335_v9 = vpop.eup %1334 }
 0xc4f   :  { %723 = vrot.lane.b32.xlu0 %v1335_v9, %s1422_s1  ;;  %v1337_v36 = vpop.eup %1336 }
 0xc50   :  { %v745_v42 = vadd.f32 1.0, %v1337_v36  ;;  %v1339_v33 = vpop.eup %1338 }
 0xc51   :  { %v704_v37 = vadd.f32 1.0, %v1339_v33 }
 0xc52   :  { %1340 = vrcp.f32 %v745_v42  ;;  %v757_v5 = vand.u32 2147483648, %v745_v42  ;;  %vm751_vm12 = vweird.f32 %v745_v42  ;;  %v755_v16 = vand.u32 2147483647, %v745_v42 }
 0xc53   :  { %1342 = vrcp.f32 %v704_v37  ;;  %v716_v20 = vand.u32 2147483648, %v704_v37  ;;  %vm710_vm0 = vweird.f32 %v704_v37  ;;  %v714_v21 = vand.u32 2147483647, %v704_v37 }
 0xc54   :  { %v758_v19 = vor.u32 1.1754944e-38, %v757_v5  ;;  %vm756_vm15 = vcmp.eq.f32.partialorder %v755_v16, 8.507059e+37 }
 0xc55   :  { %v717_v27 = vor.u32 1.1754944e-38, %v716_v20  ;;  %vm715_vm2 = vcmp.eq.f32.partialorder %v714_v21, 8.507059e+37 }
 0xc58   :  { %v1341_v43 = vpop.eup %1340 }
 0xc59   :  { %v747_v51 = vmul.f32 %v1341_v43, %v745_v42  ;;  %v1343_v12 = vpop.eup %1342  ;;  %vm752_vm11 = vweird.f32 %v1341_v43 }
 0xc5a   :  { %v706_v3 = vmul.f32 %v1343_v12, %v704_v37  ;;  %vm753_vm13 = vmor %vm751_vm12, %vm752_vm11  ;;  %vm711_vm14 = vweird.f32 %v1343_v12 }
 0xc5b   :  { %v748_v49 = vsub.f32 1.0, %v747_v51  ;;  %vm712_vm1 = vmor %vm710_vm0, %vm711_vm14 }
 0xc5c   :  { %v707_v13 = vsub.f32 1.0, %v706_v3 }
 0xc5d   :  { %v749_v62 = vmul.f32 %v1341_v43, %v748_v49 }
 0xc5e   :  { %v708_v15 = vmul.f32 %v1343_v12, %v707_v13 }
 0xc5f   :  { %v750_v14 = vadd.f32 %v1341_v43, %v749_v62 }
 0xc60   :  { %v709_v18 = vadd.f32 %v1343_v12, %v708_v15 }
 0xc61   :  { %v754_v17 = vsel %vm753_vm13, %v1341_v43, %v750_v14 }
 0xc62   :  { %v759_v23 = vsel %vm756_vm15, %v758_v19, %v754_v17  ;;  %v713_v26 = vsel %vm712_vm1, %v1343_v12, %v709_v18 }
 0xc63   :  { %v718_v30 = vsel %vm715_vm2, %v717_v27, %v713_v26  ;;  %v765_v41 = vmul.f32 %v763_v39, %v759_v23 }
 0xc64   :  { %v721_v32 = vmul.f32 %v718_v30, %v1667_v55 }
 0xcbd   :  { %v768_v22 = vpop.permute.xlu1 %767 }
 0xcbe   :  { %v770_v25 = vmul.f32 %v768_v22, %v759_v23 }
 0xcc0   :  { %772 = vrot.lane.b32.xlu0 %v770_v25, %s1423_s2 }
 0xcc1   :  { %v724_v28 = vpop.permute.xlu0 %723 }
 0xcc2   :  { %v726_v31 = vmul.f32 %v724_v28, %v718_v30 }
 0xcc4   :  { %728 = vrot.lane.b32.xlu2 %v726_v31, %s1423_s2 }
 0xd1e   :  { %v729_v34 = vpop.permute.xlu2 %728 }
 0xd1f   :  { %v1683_v35 = vadd.f32 %v729_v34, %v721_v32 }
 0xd21   :  { %1344 = vtanh.f32 %v1683_v35 }
 0xd27   :  { %v1345_v38 = vpop.eup %1344 }
 0xd28   :  { %734 = vrot.lane.b32.xlu1 %v1345_v38, %s1422_s1 }
 0xd32   :  { %v773_v44 = vpop.permute.xlu0 %772 }
 0xd33   :  { %v1688_v45 = vadd.f32 %v773_v44, %v765_v41 }
 0xd35   :  { %1346 = vtanh.f32 %v1688_v45 }
 0xd3b   :  { %v1347_v46 = vpop.eup %1346 }
 0xd3c   :  { %778 = vrot.lane.b32.xlu2 %v1347_v46, %s1422_s1 }
 0xd96   :  { %v779_v50 = vpop.permute.xlu2 %778 }
 0xd97   :  { %v781_v52 = vmul.f32 %v779_v50, %v759_v23 }
 0xd99   :  { %783 = vrot.lane.b32.xlu0 %v781_v52, %s1423_s2 }
 0xd9a   :  { %v735_v54 = vpop.permute.xlu1 %734 }
 0xd9b   :  { %v737_v55 = vmul.f32 %v735_v54, %v718_v30  ;;  %v887_v30 = vrot.slane %v1688_v45, 6 }
 0xd9d   :  { %v787_v57 = vrot.slane %v737_v55, 6 }
 0xd9f   :  { %788 = vrot.lane.b32.xlu1 %v787_v57, %s1422_s1 }
 0xe0b   :  { %v784_v24 = vpop.permute.xlu0 %783 }
 0xe11   :  { %v789_v48 = vpop.permute.xlu1 %788 }
 0xe12   :  { %v791_v59 = vsel %vm134_vm5, %v784_v24, %v789_v48 }
 0xe13   :  { %v792_v60 = vpack.c.bf16 %v791_v59, %v791_v59 }
 0xe15   :  { %v794_v61 = vrot.slane %v792_v60, 1 }
 0xe17   :  { %1231 = vmatmul.msk.bf16.vlgmr.msra.gmra.mxu3 %vm177_vm6, %v794_v61  ;;  %1232 = vmatmul.msk.bf16.vlgmr.msrb.gmra.mxu0 %vm177_vm6, %v794_v61  ;;  %v1722_v61 = vld [vmem:[%s1773_s4] ss:$0 sm:$0xff] }
 0xe94   :  { %v820_v58 = vpop.f32.mrf.mxu0 }
 0xe95   :  { %v824_v63 = vadd.f32 %v1561_v56, %v820_v58 }
 0xe97   :  { %1348 = vtanh.f32 %v824_v63  ;;  %v1233_v6 = vmul.f32 -1.442695, %v824_v63 }
 0xe9a   :  { %v807_v40 = vpop.f32.mrf.mxu3 }
 0xe9b   :  { %v863_v0 = vrot.slane %v807_v40, 4 }
 0xe9c   :  { %v822_v1 = vpop.f32.mrf.mxu0 }
 0xe9d   :  { %v1349_v47 = vpop.eup %1348  ;;  %v865_v53 = vadd.f32 %v863_v0, %v1654_v29 }
 0xe9e   :  { %847 = vrot.lane.b32.xlu2 %v1349_v47, %s1422_s1 }
 0xe9f   :  { %1350 = vtanh.f32 %v865_v53  ;;  %v1234_v11 = vmul.f32 -1.442695, %v865_v53 }
 0xea0   :  { %1352 = vpow2.f32 %v1233_v6 }
 0xea2   :  { %v809_v2 = vpop.f32.mrf.mxu3 }
 0xea5   :  { %v1351_v4 = vpop.eup %1350 }
 0xea6   :  { %891 = vrot.lane.b32.xlu0 %v1351_v4, %s1422_s1  ;;  %v1353_v7 = vpop.eup %1352 }
 0xea7   :  { %v828_v8 = vadd.f32 1.0, %v1353_v7 }
 0xea9   :  { %1354 = vrcp.f32 %v828_v8  ;;  %v840_v33 = vand.u32 2147483648, %v828_v8  ;;  %vm834_vm4 = vweird.f32 %v828_v8  ;;  %v838_v37 = vand.u32 2147483647, %v828_v8 }
 0xeaa   :  { %1356 = vpow2.f32 %v1234_v11 }
 0xeab   :  { %v841_v12 = vor.u32 1.1754944e-38, %v840_v33  ;;  %vm839_vm8 = vcmp.eq.f32.partialorder %v838_v37, 8.507059e+37 }
 0xeaf   :  { %v1355_v56 = vpop.eup %1354 }
 0xeb0   :  { %v830_v9 = vmul.f32 %v1355_v56, %v828_v8  ;;  %vm835_vm3 = vweird.f32 %v1355_v56  ;;  %v1357_v43 = vpop.eup %1356 }
 0xeb1   :  { %vm836_vm7 = vmor %vm834_vm4, %vm835_vm3  ;;  %v869_v49 = vadd.f32 1.0, %v1357_v43 }
 0xeb2   :  { %v831_v10 = vsub.f32 1.0, %v830_v9 }
 0xeb3   :  { %1358 = vrcp.f32 %v869_v49  ;;  %v881_v18 = vand.u32 2147483648, %v869_v49  ;;  %vm875_vm10 = vweird.f32 %v869_v49  ;;  %v879_v19 = vand.u32 2147483647, %v869_v49 }
 0xeb4   :  { %v832_v36 = vmul.f32 %v1355_v56, %v831_v10 }
 0xeb5   :  { %v882_v21 = vor.u32 1.1754944e-38, %v881_v18  ;;  %vm880_vm12 = vcmp.eq.f32.partialorder %v879_v19, 8.507059e+37 }
 0xeb6   :  { %v833_v42 = vadd.f32 %v1355_v56, %v832_v36 }
 0xeb8   :  { %v837_v51 = vsel %vm836_vm7, %v1355_v56, %v833_v42 }
 0xeb9   :  { %v842_v62 = vsel %vm839_vm8, %v841_v12, %v837_v51  ;;  %v1359_v14 = vpop.eup %1358 }
 0xeba   :  { %v871_v15 = vmul.f32 %v1359_v14, %v869_v49  ;;  %vm876_vm9 = vweird.f32 %v1359_v14  ;;  %v845_v26 = vmul.f32 %v842_v62, %v1683_v35 }
 0xebb   :  { %vm877_vm11 = vmor %vm875_vm10, %vm876_vm9  ;;  %vm1130_vm10 = vcmask 91136  }
 0xebc   :  { %v872_v5 = vsub.f32 1.0, %v871_v15 }
 0xebe   :  { %v873_v16 = vmul.f32 %v1359_v14, %v872_v5 }
 0xec0   :  { %v874_v17 = vadd.f32 %v1359_v14, %v873_v16 }
 0xec2   :  { %v878_v20 = vsel %vm877_vm11, %v1359_v14, %v874_v17  ;;  %vm1143_vm11 = vcmask 1043456  }
 0xec3   :  { %v883_v23 = vsel %vm880_vm12, %v882_v21, %v878_v20 }
 0xec4   :  { %v889_v31 = vmul.f32 %v887_v30, %v883_v23 }
 0xef8   :  { %v848_v3 = vpop.permute.xlu2 %847 }
 0xef9   :  { %v850_v13 = vmul.f32 %v848_v3, %v842_v62 }
 0xefb   :  { %852 = vrot.lane.b32.xlu1 %v850_v13, %s1423_s2 }
 0xf18   :  { %v892_v22 = vpop.permute.xlu0 %891 }
 0xf19   :  { %v894_v25 = vmul.f32 %v892_v22, %v883_v23 }
 0xf1b   :  { %896 = vrot.lane.b32.xlu2 %v894_v25, %s1423_s2 }
 0xf6d   :  { %v853_v27 = vpop.permute.xlu1 %852 }
 0xf6e   :  { %v1704_v28 = vadd.f32 %v853_v27, %v845_v26 }
 0xf70   :  { %1360 = vtanh.f32 %v1704_v28 }
 0xf75   :  { %v897_v32 = vpop.permute.xlu2 %896 }
 0xf76   :  { %v1361_v34 = vpop.eup %1360  ;;  %v1708_v38 = vadd.f32 %v897_v32, %v889_v31 }
 0xf77   :  { %858 = vrot.lane.b32.xlu0 %v1361_v34, %s1422_s1 }
 0xf78   :  { %1362 = vtanh.f32 %v1708_v38  ;;  %v1011_v20 = vrot.slane %v1708_v38, 6 }
 0xf7e   :  { %v1363_v39 = vpop.eup %1362 }
 0xf7f   :  { %902 = vrot.lane.b32.xlu1 %v1363_v39, %s1422_s1 }
 0xfe9   :  { %v859_v35 = vpop.permute.xlu0 %858 }
 0xfea   :  { %v861_v41 = vmul.f32 %v859_v35, %v842_v62 }
 0xfec   :  { %v911_v44 = vrot.slane %v861_v41, 4 }
 0xfee   :  { %912 = vrot.lane.b32.xlu0 %v911_v44, %s1422_s1 }
 0xff1   :  { %v903_v46 = vpop.permute.xlu1 %902 }
 0xff2   :  { %v905_v50 = vmul.f32 %v903_v46, %v883_v23 }
 0xff4   :  { %907 = vrot.lane.b32.xlu2 %v905_v50, %s1423_s2 }
0x104e   :  { %v908_v45 = vpop.permute.xlu2 %907 }
0x1060   :  { %v913_v52 = vpop.permute.xlu0 %912 }
0x1061   :  { %v915_v54 = vsel %vm134_vm5, %v908_v45, %v913_v52 }
0x1062   :  { %v916_v55 = vpack.c.bf16 %v915_v54, %v915_v54 }
0x1064   :  { %v918_v57 = vrot.slane %v916_v55, 2 }
0x1066   :  { %1235 = vmatmul.msk.bf16.vlgmr.msrb.gmra.mxu1 %vm177_vm6, %v918_v57  ;;  %1236 = vmatmul.msk.bf16.vlgmr.msrb.gmra.mxu2 %vm177_vm6, %v918_v57 }
0x10e3   :  { %v931_v24 = vpop.f32.mrf.mxu1 }
0x10e4   :  { %v987_v48 = vrot.slane %v931_v24, 2 }
0x10e6   :  { %v989_v59 = vadd.f32 %v987_v48, %v1654_v29 }
0x10e8   :  { %1364 = vtanh.f32 %v989_v59  ;;  %v1238_v47 = vmul.f32 -1.442695, %v989_v59 }
0x10e9   :  { %v944_v60 = vpop.f32.mrf.mxu2 }
0x10ea   :  { %v948_v58 = vadd.f32 %v1722_v61, %v944_v60 }
0x10eb   :  { %v933_v63 = vpop.f32.mrf.mxu1 }
0x10ec   :  { %1366 = vtanh.f32 %v948_v58  ;;  %v1237_v6 = vmul.f32 -1.442695, %v948_v58 }
0x10ed   :  { %1368 = vpow2.f32 %v1238_v47 }
0x10ee   :  { %v1365_v40 = vpop.eup %1364 }
0x10ef   :  { %1015 = vrot.lane.b32.xlu2 %v1365_v40, %s1422_s1 }
0x10f1   :  { %v946_v0 = vpop.f32.mrf.mxu2 }
0x10f2   :  { %v1367_v1 = vpop.eup %1366 }
0x10f3   :  { %971 = vrot.lane.b32.xlu1 %v1367_v1, %s1422_s1  ;;  %v1369_v29 = vpop.eup %1368 }
0x10f4   :  { %v993_v53 = vadd.f32 1.0, %v1369_v29 }
0x10f6   :  { %1370 = vrcp.f32 %v993_v53  ;;  %v1005_v10 = vand.u32 2147483648, %v993_v53  ;;  %vm999_vm14 = vweird.f32 %v993_v53  ;;  %v1003_v11 = vand.u32 2147483647, %v993_v53 }
0x10f7   :  { %1372 = vpow2.f32 %v1237_v6 }
0x10f8   :  { %v1006_v33 = vor.u32 1.1754944e-38, %v1005_v10  ;;  %vm1004_vm0 = vcmp.eq.f32.partialorder %v1003_v11, 8.507059e+37  ;;  %v1098_v10 = vld [vmem:[%s1774_s5 + $0x8] sm:$0xff]  ;;  %v1097_v11 = vld [vmem:[%s1774_s5] sm:$0xff] }
0x10fc   :  { %v1371_v2 = vpop.eup %1370 }
0x10fd   :  { %v995_v4 = vmul.f32 %v1371_v2, %v993_v53  ;;  %v1373_v56 = vpop.eup %1372  ;;  %vm1000_vm13 = vweird.f32 %v1371_v2 }
0x10fe   :  { %v952_v36 = vadd.f32 1.0, %v1373_v56  ;;  %vm1001_vm15 = vmor %vm999_vm14, %vm1000_vm13  ;;  %v1100_v56 = vld [vmem:[%s1774_s5 + $0x18] sm:$0xff] }
0x10ff   :  { %v996_v7 = vsub.f32 1.0, %v995_v4  ;;  %1122 = vmatpush.msra.mxu0 %v1100_v56 }
0x1100   :  { %1374 = vrcp.f32 %v952_v36  ;;  %v964_v14 = vand.u32 2147483648, %v952_v36  ;;  %vm958_vm2 = vweird.f32 %v952_v36  ;;  %v962_v15 = vand.u32 2147483647, %v952_v36 }
0x1101   :  { %v997_v8 = vmul.f32 %v1371_v2, %v996_v7 }
0x1102   :  { %v965_v16 = vor.u32 1.1754944e-38, %v964_v14  ;;  %vm963_vm4 = vcmp.eq.f32.partialorder %v962_v15, 8.507059e+37 }
0x1103   :  { %v998_v9 = vadd.f32 %v1371_v2, %v997_v8 }
0x1105   :  { %v1002_v42 = vsel %vm1001_vm15, %v1371_v2, %v998_v9  ;;  %v1099_v9 = vld [vmem:[%s1774_s5 + $0x10] sm:$0xff] }
0x1106   :  { %v1007_v43 = vsel %vm1004_vm0, %v1006_v33, %v1002_v42  ;;  %v1375_v12 = vpop.eup %1374  ;;  %1123 = vmatpush.msra.mxu0 %v1099_v9 }
0x1107   :  { %v954_v49 = vmul.f32 %v1375_v12, %v952_v36  ;;  %vm959_vm1 = vweird.f32 %v1375_v12  ;;  %v1013_v21 = vmul.f32 %v1011_v20, %v1007_v43 }
0x1108   :  { %vm960_vm3 = vmor %vm958_vm2, %vm959_vm1  ;;  %1124 = vmatpush.msra.mxu0 %v1098_v10 }
0x1109   :  { %v955_v3 = vsub.f32 1.0, %v954_v49  ;;  %v1138_v49 = vld [vmem:[%s1776_s7 + $0x8] sm:$0xf] }
0x110a   :  { %1125 = vmatpush.msra.mxu0 %v1097_v11 }
0x110b   :  { %v956_v62 = vmul.f32 %v1375_v12, %v955_v3  ;;  %v1137_v3 = vld [vmem:[%s1776_s7] sm:$0xff] }
0x110c   :  { %1242 = vmatpush.msk.msrb.mxu0 %vm1143_vm11, %v1138_v49 }
0x110d   :  { %v957_v13 = vadd.f32 %v1375_v12, %v956_v62 }
0x110e   :  { %1162 = vmatpush.msrb.mxu0 %v1137_v3 }
0x110f   :  { %v961_v5 = vsel %vm960_vm3, %v1375_v12, %v957_v13 }
0x1110   :  { %v966_v18 = vsel %vm963_vm4, %v965_v16, %v961_v5 }
0x1111   :  { %v969_v26 = vmul.f32 %v966_v18, %v1704_v28 }
0x1149   :  { %v1016_v37 = vpop.permute.xlu2 %1015 }
0x114a   :  { %v1018_v51 = vmul.f32 %v1016_v37, %v1007_v43  ;;  %v1259_v37 = vld [vmem:[%s1775_s6] ss:$0 sm:$0xff] }
0x114c   :  { %1020 = vrot.lane.b32.xlu1 %v1018_v51, %s1423_s2 }
0x1165   :  { %v972_v17 = vpop.permute.xlu1 %971 }
0x1166   :  { %v974_v19 = vmul.f32 %v972_v17, %v966_v18 }
0x1168   :  { %976 = vrot.lane.b32.xlu0 %v974_v19, %s1423_s2 }
0x11be   :  { %v1021_v22 = vpop.permute.xlu1 %1020 }
0x11bf   :  { %v1023_v23 = vadd.f32 %v1021_v22, %v1013_v21 }
0x11c1   :  { %1376 = vtanh.f32 %v1023_v23 }
0x11c7   :  { %v1377_v25 = vpop.eup %1376 }
0x11c8   :  { %1026 = vrot.lane.b32.xlu0 %v1377_v25, %s1422_s1 }
0x11da   :  { %v977_v27 = vpop.permute.xlu0 %976 }
0x11db   :  { %v979_v30 = vadd.f32 %v977_v27, %v969_v26 }
0x11dd   :  { %1378 = vtanh.f32 %v979_v30 }
0x11e3   :  { %v1379_v31 = vpop.eup %1378 }
0x11e4   :  { %982 = vrot.lane.b32.xlu2 %v1379_v31, %s1422_s1 }
0x123a   :  { %v1027_v32 = vpop.permute.xlu0 %1026 }
0x123b   :  { %v1029_v34 = vmul.f32 %v1027_v32, %v1007_v43 }
0x123d   :  { %1031 = vrot.lane.b32.xlu1 %v1029_v34, %s1423_s2 }
0x123e   :  { %v983_v38 = vpop.permute.xlu2 %982 }
0x123f   :  { %v985_v39 = vmul.f32 %v983_v38, %v966_v18 }
0x1241   :  { %v1035_v35 = vrot.slane %v985_v39, 2 }
0x1243   :  { %1036 = vrot.lane.b32.xlu2 %v1035_v35, %s1422_s1 }
0x129d   :  { %v1037_v41 = vpop.permute.xlu2 %1036 }
0x12af   :  { %v1032_v44 = vpop.permute.xlu1 %1031 }
0x12b0   :  { %v1039_v46 = vsel %vm134_vm5, %v1032_v44, %v1037_v41 }
0x12b1   :  { %v1040_v28 = vpack.c.bf16 %v1039_v46, %v1039_v46 }
0x12b3   :  { %v1042_v50 = vrot.slane %v1040_v28, 3 }
0x12b5   :  { %1239 = vmatmul.msk.bf16.vlgmr.msrb.gmra.mxu3 %vm177_vm6, %v1042_v50 }
0x1338   :  { %v1055_v45 = vpop.f32.mrf.mxu3 }
0x1339   :  { %v1059_v52 = vadd.f32 %v1722_v61, %v1055_v45 }
0x133b   :  { %1380 = vtanh.f32 %v1059_v52  ;;  %v1240_v57 = vmul.f32 -1.442695, %v1059_v52 }
0x133d   :  { %1382 = vpow2.f32 %v1240_v57 }
0x1340   :  { %v1057_v54 = vpop.f32.mrf.mxu3 }
0x1341   :  { %v1381_v55 = vpop.eup %1380 }
0x1342   :  { %1082 = vrot.lane.b32.xlu0 %v1381_v55, %s1422_s1 }
0x1343   :  { %v1383_v24 = vpop.eup %1382 }
0x1344   :  { %v1063_v48 = vadd.f32 1.0, %v1383_v24 }
0x1346   :  { %1384 = vrcp.f32 %v1063_v48  ;;  %v1075_v0 = vand.u32 2147483648, %v1063_v48  ;;  %vm1069_vm6 = vweird.f32 %v1063_v48  ;;  %v1073_v1 = vand.u32 2147483647, %v1063_v48 }
0x1348   :  { %v1076_v47 = vor.u32 1.1754944e-38, %v1075_v0  ;;  %vm1074_vm9 = vcmp.eq.f32.partialorder %v1073_v1, 8.507059e+37 }
0x134c   :  { %v1385_v59 = vpop.eup %1384 }
0x134d   :  { %v1065_v60 = vmul.f32 %v1385_v59, %v1063_v48  ;;  %vm1070_vm7 = vweird.f32 %v1385_v59 }
0x134e   :  { %vm1071_vm8 = vmor %vm1069_vm6, %vm1070_vm7 }
0x134f   :  { %v1066_v58 = vsub.f32 1.0, %v1065_v60 }
0x1351   :  { %v1067_v63 = vmul.f32 %v1385_v59, %v1066_v58 }
0x1353   :  { %v1068_v40 = vadd.f32 %v1385_v59, %v1067_v63 }
0x1355   :  { %v1072_v61 = vsel %vm1071_vm8, %v1385_v59, %v1068_v40 }
0x1356   :  { %v1077_v53 = vsel %vm1074_vm9, %v1076_v47, %v1072_v61 }
0x1357   :  { %v1080_v4 = vmul.f32 %v1077_v53, %v979_v30 }
0x13b4   :  { %v1083_v29 = vpop.permute.xlu0 %1082 }
0x13b5   :  { %v1085_v2 = vmul.f32 %v1083_v29, %v1077_v53 }
0x13b7   :  { %1087 = vrot.lane.b32.xlu1 %v1085_v2, %s1423_s2 }
0x1429   :  { %v1088_v6 = vpop.permute.xlu1 %1087 }
0x142a   :  { %v1090_v7 = vadd.f32 %v1088_v6, %v1080_v4 }
0x142c   :  { %1386 = vtanh.f32 %v1090_v7 }
0x1432   :  { %v1387_v8 = vpop.eup %1386 }
0x1433   :  { %1093 = vrot.lane.b32.xlu2 %v1387_v8, %s1422_s1 }
0x148d   :  { %v1094_v36 = vpop.permute.xlu2 %1093 }
0x148e   :  { %v1096_v42 = vmul.f32 %v1094_v36, %v1077_v53 }
0x1490   :  { %1106 = vrot.lane.b32.xlu0 %v1096_v42, %s1423_s2 }
0x1502   :  { %v1107_v33 = vpop.permute.xlu0 %1106 }
0x1503   :  { %1241 = vmatmul.msk.f32.vlgmr.msra.gmra.mxu0 %vm134_vm5, %v1107_v33  ;;  %vm1139_vm5 = vcmask 97280  }
0x1580   :  { %v1127_v43 = vpop.f32.mrf.mxu0 }
0x1581   :  { %v1128_v51 = vadd.f32 %v1259_v37, %v1127_v43 }
0x1583   :  { %v1131_v12 = vsel %vm1130_vm10, %v1128_v51, -inf }
0x1584   :  { %1132 = vmax.xlane.f32.xlu1 %v1131_v12 }
0x15f7   :  { %v1133_v62 = vpop.xlane.xlu1 %1132 }
0x15f8   :  { %v1134_v13 = vsub.f32 %v1128_v51, %v1133_v62 }
0x15fa   :  { %v1135_v14 = vmul.f32 1.442695, %v1134_v13 }
0x15fc   :  { %1388 = vpow2.f32 %v1135_v14 }
0x1602   :  { %v1389_v15 = vpop.eup %1388 }
0x1603   :  { %1243 = vmatmul.msk.f32.vlgmr.msrb.gmra.mxu0 %vm1139_vm5, %v1389_v15 }
0x1680   :  { %v1164_v5 = vpop.f32.mrf.mxu0 }
0x1681   :  { %1390 = vlog2.f32 %v1164_v5 }
0x1687   :  { %v1391_v16 = vpop.eup %1390 }
0x1688   :  { %v1168_v17 = vmul.f32 0.6931472, %v1391_v16 }
0x168a   :  { %v1169_v18 = vsub.f32 %v1134_v13, %v1168_v17 }
0x168c   :  { %1170 = vst.msk [vmem:[%s1777_s8] sm:$0x3] %vm1130_vm10, %v1169_v18 }
0x168d   :  { %1175 = vsyncpa [#allocation3], 1 }

</bundles_post_ra>
